<compile_context>
chip_gen: v7x
topology: tpu7x:2x2x1
jax: 0.10.0
libtpu: 0.0.40
codegen_flags: <defaults>
</compile_context>

<pallas_src>
import functools

import jax
import jax.numpy as jnp
from jax import lax
from jax.experimental import pallas as pl
from jax.experimental.pallas import tpu as pltpu

F32 = jnp.float32


# ----------------------------------------------------------------- kernel

def _decoder_layer_kernel(
    tgt_ref, mem_ref, trow_ref, tcol_ref, last_ref, rep_ref,
    wqkv1_ref, wo1_ref, bo1_ref,
    wqkvx_ref, wo2_ref, bo2_ref,
    w1_ref, b1_ref, w2_ref, b2_ref,
    lng_ref, lnb_ref,
    learn_ref, forget_ref,
    out_ref,
    *, num_heads, eps):
  S, D = tgt_ref.shape          # (S, D): batch dim squeezed out by BlockSpec
  H = num_heads
  HD = D // H

  def layernorm(z, row):
    mu = jnp.mean(z, axis=-1, keepdims=True)
    var = jnp.mean(z * z, axis=-1, keepdims=True) - mu * mu
    return (z - mu) * lax.rsqrt(var + eps) * lng_ref[row] + lnb_ref[row]

  def attention(q_all, k_all, v_all, wo_ref, bo_ref, forget=None):
    # q_all/k_all/v_all: (S, D); head h lives in lane slice [h*HD, (h+1)*HD).
    # The 1/sqrt(HD) scale is already folded into the Q projection weights.
    scores = []
    for h in range(H):                                   # static unroll
      sl = slice(h * HD, (h + 1) * HD)
      sh = lax.dot_general(q_all[:, sl], k_all[:, sl],
                           (((1,), (1,)), ((), ())),
                           preferred_element_type=F32)   # (S, S)
      if forget is not None:
        sh = sh * forget                                 # forgetting on raw scores
      scores.append(sh)
    # Stack head scores along sublanes -> one softmax pass over (H*S, S).
    s_all = jnp.concatenate(scores, axis=0)              # (H*S, S)
    m = jnp.max(s_all, axis=-1, keepdims=True)
    e = jnp.exp(s_all - m)
    p_all = e / jnp.sum(e, axis=-1, keepdims=True)       # exact f32 division
    # Accumulate the output projection per head (no lane-axis concat).
    acc = None
    for h in range(H):
      sl = slice(h * HD, (h + 1) * HD)
      pv = jnp.dot(p_all[h * S:(h + 1) * S, :], v_all[:, sl],
                   preferred_element_type=F32)           # (S, HD)
      ch = jnp.dot(pv, wo_ref[sl, :], preferred_element_type=F32)   # (S, D)
      acc = ch if acc is None else acc + ch
    return acc + bo_ref[...]

  x0 = tgt_ref[...]            # (S, D)
  mem = mem_ref[...]           # (S, D)

  # ---- self attention (mo='encoder': no forgetting), fused QKV projection
  qkv = jnp.dot(x0, wqkv1_ref[...], preferred_element_type=F32)    # (S, 3D)
  z1 = attention(qkv[:, :D], qkv[:, D:2 * D], qkv[:, 2 * D:], wo1_ref, bo1_ref)
  x1 = layernorm(x0 + z1, 0)

  # ---- cross attention (query=key=x1, value=memory; mo='decoder')
  # Fused block-diagonal projection: [x1 | mem] @ diag(Wqk2, Wv2) = [Q2|K2|V2]
  xm = jnp.concatenate([x1, mem], axis=-1)                         # (S, 2D)
  qkv2 = jnp.dot(xm, wqkvx_ref[...], preferred_element_type=F32)   # (S, 3D)
  a_f, b_f = forget_ref[0], forget_ref[1]
  c_f, d_f = forget_ref[2], forget_ref[3]
  dist = tcol_ref[...] - trow_ref[...]            # (S,1)-(1,S) -> (S,S): t_i - t_j
  forget = c_f * (b_f / (dist + a_f)) + d_f       # shared by all heads
  z2 = attention(qkv2[:, :D], qkv2[:, D:2 * D], qkv2[:, 2 * D:],
                 wo2_ref, bo2_ref, forget=forget)

  # ---- Learning gate (scalars from SMEM, per-row gate broadcast over D)
  w_r, b_r = learn_ref[0], learn_ref[1]
  w_l, b_l = learn_ref[2], learn_ref[3]
  a_lr, b_lr, d_lr = learn_ref[4], learn_ref[5], learn_ref[6]
  rep = jnp.maximum(rep_ref[...] * w_r + b_r, 0.0)      # (S, 1)
  las = jnp.maximum(last_ref[...] * w_l + b_l, 0.0)     # (S, 1)
  lw = 1.0 / (1.0 + jnp.exp(-(a_lr * (rep / (las + 1.0)))))
  z2 = z2 * (1.0 + 2.0 * b_lr * (lw + d_lr))
  x2 = layernorm(x1 + z2, 1)

  # ---- feed forward (hidden activation never leaves the kernel)
  hdn = jnp.maximum(
      jnp.dot(x2, w1_ref[...], preferred_element_type=F32) + b1_ref[...], 0.0)
  ffn = jnp.dot(hdn, w2_ref[...], preferred_element_type=F32) + b2_ref[...]
  out_ref[...] = layernorm(x2 + ffn, 2)


# --------------------------------------------------------------- wrapper

def transformer_decoder_layer(tgt, memory, time_done, last, repeat, p):
  """tgt/memory: (S, B, D); time_done/last/repeat: (B, S). Returns (S, B, D)."""
  S, B, D = tgt.shape
  H = p['nhead']

  # Only free bitcast views below -- no transposes, no HBM copies.
  tgt4 = tgt.reshape(S, B, 1, D)
  mem4 = memory.reshape(S, B, 1, D)
  t_row = time_done.reshape(B, 1, S)     # per-batch row view  (1, S)
  t_col = time_done.reshape(B * S, 1)    # per-batch column view (S, 1)
  last_c = last.reshape(B * S, 1)
  rep_c = repeat.reshape(B * S, 1)

  def batch4():       # (S, 1, 1, D) slab for batch b, squeezed to (S, D)
    return pl.BlockSpec((S, None, None, D), lambda b: (0, b, 0, 0))

  def row_spec():     # (1, S) row for batch b
    return pl.BlockSpec((None, 1, S), lambda b: (b, 0, 0))

  def col_spec():     # (S, 1) column for batch b
    return pl.BlockSpec((S, 1), lambda b: (b, 0))

  def full(a):        # whole (small) array, constant block index -> no re-DMA
    zeros = (0,) * a.ndim
    return pl.BlockSpec(a.shape, lambda b: zeros)

  smem = pl.BlockSpec(memory_space=pltpu.MemorySpace.SMEM)

  kernel = functools.partial(_decoder_layer_kernel, num_heads=H, eps=1e-5)

  out4 = pl.pallas_call(
      kernel,
      out_shape=jax.ShapeDtypeStruct((S, B, 1, D), F32),
      grid=(B,),
      in_specs=[
          batch4(), batch4(),                 # tgt, memory
          row_spec(), col_spec(),             # time_done row / column views
          col_spec(), col_spec(),             # last, repeat columns
          full(p['wqkv1']), full(p['wo1']), full(p['bo1']),
          full(p['wqkvx']), full(p['wo2']), full(p['bo2']),
          full(p['w1']), full(p['b1']), full(p['w2']), full(p['b2']),
          full(p['ln_g']), full(p['ln_b']),
          smem, smem,
      ],
      out_specs=pl.BlockSpec((S, None, None, D), lambda b: (0, b, 0, 0)),
      compiler_params=pltpu.CompilerParams(
          dimension_semantics=("parallel",)),
  )(tgt4, mem4, t_row, t_col, last_c, rep_c,
    p['wqkv1'], p['wo1'], p['bo1'],
    p['wqkvx'], p['wo2'], p['bo2'],
    p['w1'], p['b1'], p['w2'], p['b2'],
    p['ln_g'], p['ln_b'], p['learn'], p['forget'])

  return out4.reshape(S, B, D)              # free bitcast back to (S, B, D)


# ------------------------------------------------------------ param init

def _xavier_uniform(key, out_f, in_f):
  limit = (6.0 / (in_f + out_f)) ** 0.5
  return jax.random.uniform(key, (out_f, in_f), F32, -limit, limit)


def _torch_linear_init(key, out_f, in_f):
  kw, kb = jax.random.split(key)
  lim = 1.0 / (in_f ** 0.5)
  w = jax.random.uniform(kw, (out_f, in_f), F32, -lim, lim)
  b = jax.random.uniform(kb, (out_f,), F32, -lim, lim)
  return w, b


if __name__ == "__main__":
  S, B, D, H, FF = 8, 2, 32, 4, 64
  HD = D // H
  scale = float(HD) ** -0.5

  root = jax.random.PRNGKey(0)
  ks = jax.random.split(root, 12)

  # self-attention projections (xavier uniform, no bias -- matches F.linear(W))
  wq1 = _xavier_uniform(ks[0], D, D)
  wk1 = _xavier_uniform(ks[1], D, D)
  wv1 = _xavier_uniform(ks[2], D, D)
  wo1_w, wo1_b = _torch_linear_init(ks[3], D, D)
  # cross-attention projections
  wq2 = _xavier_uniform(ks[4], D, D)
  wk2 = _xavier_uniform(ks[5], D, D)
  wv2 = _xavier_uniform(ks[6], D, D)
  wo2_w, wo2_b = _torch_linear_init(ks[7], D, D)
  # feed-forward
  w1_w, w1_b = _torch_linear_init(ks[8], FF, D)
  w2_w, w2_b = _torch_linear_init(ks[9], D, FF)
  # Learning 1x1 linears
  wr_w, wr_b = _torch_linear_init(ks[10], 1, 1)
  wl_w, wl_b = _torch_linear_init(ks[11], 1, 1)

  # Fused self-attn Q|K|V weight (query scale folded into the Q columns).
  wqkv1 = jnp.concatenate([wq1.T * scale, wk1.T, wv1.T], axis=1)   # (D, 3D)
  # Fused block-diagonal cross-attn weight: [x1 | mem] -> [Q2 | K2 | V2].
  wqkvx = jnp.zeros((2 * D, 3 * D), F32)
  wqkvx = wqkvx.at[:D, :D].set(wq2.T * scale)
  wqkvx = wqkvx.at[:D, D:2 * D].set(wk2.T)
  wqkvx = wqkvx.at[D:, 2 * D:].set(wv2.T)

  params = dict(
      nhead=H,
      wqkv1=wqkv1,
      wo1=wo1_w.T, bo1=wo1_b.reshape(1, D),
      wqkvx=wqkvx,
      wo2=wo2_w.T, bo2=wo2_b.reshape(1, D),
      w1=w1_w.T, b1=w1_b.reshape(1, FF),
      w2=w2_w.T, b2=w2_b.reshape(1, D),
      # LayerNorm affine params, rows 0/1/2 = norm1/norm2/norm3
      ln_g=jnp.ones((3, 1, D), F32), ln_b=jnp.zeros((3, 1, D), F32),
      # Learning scalars: [w_repeat, b_repeat, w_last, b_last, a=100, b=0.2, d=-0.5, pad]
      learn=jnp.array([wr_w[0, 0], wr_b[0], wl_w[0, 0], wl_b[0],
                       100.0, 0.2, -0.5, 0.0], F32),
      # forgetting scalars: [a=0.1, b=1, c=1, d=1]
      forget=jnp.array([0.1, 1.0, 1.0, 1.0], F32),
  )

  kin = jax.random.split(jax.random.PRNGKey(1), 5)
  tgt = jax.random.normal(kin[0], (S, B, D), F32)
  memory = jax.random.normal(kin[1], (S, B, D), F32)
  time_done = jax.random.uniform(kin[2], (B, S), F32, 0.0, 5.0)
  last = jax.random.uniform(kin[3], (B, S), F32, 0.0, 5.0)
  repeat = jax.random.uniform(kin[4], (B, S), F32, 0.0, 5.0)

  out = transformer_decoder_layer(tgt, memory, time_done, last, repeat, params)
  jax.block_until_ready(out)
  assert out.shape == (S, B, D) and out.dtype == F32
  assert bool(jnp.all(jnp.isfinite(out)))
  print("KERNEL_OK")
</pallas_src>

<mosaic_0001>
module attributes {stable_mosaic.version = 11 : i64} {
  func.func @_decoder_layer_kernel(%arg0: i32, %arg1: memref<8x1x1x32xf32, #tpu.memory_space<vmem>>, %arg2: memref<8x1x1x32xf32, #tpu.memory_space<vmem>>, %arg3: memref<1x1x8xf32, #tpu.memory_space<vmem>>, %arg4: memref<8x1xf32, #tpu.memory_space<vmem>>, %arg5: memref<8x1xf32, #tpu.memory_space<vmem>>, %arg6: memref<8x1xf32, #tpu.memory_space<vmem>>, %arg7: memref<32x96xf32, #tpu.memory_space<vmem>>, %arg8: memref<32x32xf32, #tpu.memory_space<vmem>>, %arg9: memref<1x32xf32, #tpu.memory_space<vmem>>, %arg10: memref<64x96xf32, #tpu.memory_space<vmem>>, %arg11: memref<32x32xf32, #tpu.memory_space<vmem>>, %arg12: memref<1x32xf32, #tpu.memory_space<vmem>>, %arg13: memref<32x64xf32, #tpu.memory_space<vmem>>, %arg14: memref<1x64xf32, #tpu.memory_space<vmem>>, %arg15: memref<64x32xf32, #tpu.memory_space<vmem>>, %arg16: memref<1x32xf32, #tpu.memory_space<vmem>>, %arg17: memref<3x1x32xf32, #tpu.memory_space<vmem>>, %arg18: memref<3x1x32xf32, #tpu.memory_space<vmem>>, %arg19: memref<8xf32, #tpu.memory_space<smem>>, %arg20: memref<4xf32, #tpu.memory_space<smem>>, %arg21: memref<8x1x1x32xf32, #tpu.memory_space<vmem>>) attributes {dimension_semantics = [#tpu.dimension_semantics<parallel>], iteration_bounds = array<i64: 2>, scalar_prefetch = 0 : i64, scratch_operands = 0 : i64, tpu.core_type = #tpu.core_type<tc>, window_params = [{transform_indices = @transform_0, window_bounds = array<i64: 8, 1, 1, 32>}, {transform_indices = @transform_1, window_bounds = array<i64: 8, 1, 1, 32>}, {transform_indices = @transform_2, window_bounds = array<i64: 1, 1, 8>}, {transform_indices = @transform_3, window_bounds = array<i64: 8, 1>}, {transform_indices = @transform_4, window_bounds = array<i64: 8, 1>}, {transform_indices = @transform_5, window_bounds = array<i64: 8, 1>}, {pipeline_mode = #tpu.pipeline_mode<synchronous>, transform_indices = @transform_6, window_bounds = array<i64: 32, 96>}, {pipeline_mode = #tpu.pipeline_mode<synchronous>, transform_indices = @transform_7, window_bounds = array<i64: 32, 32>}, {pipeline_mode = #tpu.pipeline_mode<synchronous>, transform_indices = @transform_8, window_bounds = array<i64: 1, 32>}, {pipeline_mode = #tpu.pipeline_mode<synchronous>, transform_indices = @transform_9, window_bounds = array<i64: 64, 96>}, {pipeline_mode = #tpu.pipeline_mode<synchronous>, transform_indices = @transform_10, window_bounds = array<i64: 32, 32>}, {pipeline_mode = #tpu.pipeline_mode<synchronous>, transform_indices = @transform_11, window_bounds = array<i64: 1, 32>}, {pipeline_mode = #tpu.pipeline_mode<synchronous>, transform_indices = @transform_12, window_bounds = array<i64: 32, 64>}, {pipeline_mode = #tpu.pipeline_mode<synchronous>, transform_indices = @transform_13, window_bounds = array<i64: 1, 64>}, {pipeline_mode = #tpu.pipeline_mode<synchronous>, transform_indices = @transform_14, window_bounds = array<i64: 64, 32>}, {pipeline_mode = #tpu.pipeline_mode<synchronous>, transform_indices = @transform_15, window_bounds = array<i64: 1, 32>}, {pipeline_mode = #tpu.pipeline_mode<synchronous>, transform_indices = @transform_16, window_bounds = array<i64: 3, 1, 32>}, {pipeline_mode = #tpu.pipeline_mode<synchronous>, transform_indices = @transform_17, window_bounds = array<i64: 3, 1, 32>}, {transform_indices = @transform_18, window_bounds = array<i64: 8>}, {transform_indices = @transform_19, window_bounds = array<i64: 4>}, {transform_indices = @transform_20, window_bounds = array<i64: 8, 1, 1, 32>}]} {
    %c0 = arith.constant 0 : index
    %c0_0 = arith.constant 0 : index
    %c0_1 = arith.constant 0 : index
    %c0_2 = arith.constant 0 : index
    %0 = vector.load %arg1[%c0, %c0_0, %c0_1, %c0_2] : memref<8x1x1x32xf32, #tpu.memory_space<vmem>>, vector<8x1x1x32xf32>
    %1 = vector.shape_cast %0 : vector<8x1x1x32xf32> to vector<8x32xf32>
    %c0_3 = arith.constant 0 : index
    %c0_4 = arith.constant 0 : index
    %c0_5 = arith.constant 0 : index
    %c0_6 = arith.constant 0 : index
    %2 = vector.load %arg2[%c0_3, %c0_4, %c0_5, %c0_6] : memref<8x1x1x32xf32, #tpu.memory_space<vmem>>, vector<8x1x1x32xf32>
    %3 = vector.shape_cast %2 : vector<8x1x1x32xf32> to vector<8x32xf32>
    %c0_7 = arith.constant 0 : index
    %c0_8 = arith.constant 0 : index
    %4 = vector.load %arg7[%c0_7, %c0_8] : memref<32x96xf32, #tpu.memory_space<vmem>>, vector<32x96xf32>
    %cst = arith.constant dense<0.000000e+00> : vector<8x96xf32>
    %5 = tpu.matmul %1, %4, %cst {dimension_numbers = #tpu.dot_dimension_numbers<[1], [0], [0], [1], [0, 0, 1, 1], [], []>} : vector<8x32xf32>, vector<32x96xf32>, vector<8x96xf32> -> vector<8x96xf32>
    %6 = vector.extract_strided_slice %5 {offsets = [0, 0], sizes = [8, 32], strides = [1, 1]} : vector<8x96xf32> to vector<8x32xf32>
    %7 = vector.extract_strided_slice %5 {offsets = [0, 32], sizes = [8, 32], strides = [1, 1]} : vector<8x96xf32> to vector<8x32xf32>
    %8 = vector.extract_strided_slice %5 {offsets = [0, 64], sizes = [8, 32], strides = [1, 1]} : vector<8x96xf32> to vector<8x32xf32>
    %9 = vector.extract_strided_slice %6 {offsets = [0, 0], sizes = [8, 8], strides = [1, 1]} : vector<8x32xf32> to vector<8x8xf32>
    %10 = vector.extract_strided_slice %7 {offsets = [0, 0], sizes = [8, 8], strides = [1, 1]} : vector<8x32xf32> to vector<8x8xf32>
    %cst_9 = arith.constant dense<0.000000e+00> : vector<8x8xf32>
    %11 = tpu.matmul %9, %10, %cst_9 {dimension_numbers = #tpu.dot_dimension_numbers<[1], [1], [0], [0], [0, 0, 1, 0], [], []>} : vector<8x8xf32>, vector<8x8xf32>, vector<8x8xf32> -> vector<8x8xf32>
    %12 = vector.extract_strided_slice %6 {offsets = [0, 8], sizes = [8, 8], strides = [1, 1]} : vector<8x32xf32> to vector<8x8xf32>
    %13 = vector.extract_strided_slice %7 {offsets = [0, 8], sizes = [8, 8], strides = [1, 1]} : vector<8x32xf32> to vector<8x8xf32>
    %cst_10 = arith.constant dense<0.000000e+00> : vector<8x8xf32>
    %14 = tpu.matmul %12, %13, %cst_10 {dimension_numbers = #tpu.dot_dimension_numbers<[1], [1], [0], [0], [0, 0, 1, 0], [], []>} : vector<8x8xf32>, vector<8x8xf32>, vector<8x8xf32> -> vector<8x8xf32>
    %15 = vector.extract_strided_slice %6 {offsets = [0, 16], sizes = [8, 8], strides = [1, 1]} : vector<8x32xf32> to vector<8x8xf32>
    %16 = vector.extract_strided_slice %7 {offsets = [0, 16], sizes = [8, 8], strides = [1, 1]} : vector<8x32xf32> to vector<8x8xf32>
    %cst_11 = arith.constant dense<0.000000e+00> : vector<8x8xf32>
    %17 = tpu.matmul %15, %16, %cst_11 {dimension_numbers = #tpu.dot_dimension_numbers<[1], [1], [0], [0], [0, 0, 1, 0], [], []>} : vector<8x8xf32>, vector<8x8xf32>, vector<8x8xf32> -> vector<8x8xf32>
    %18 = vector.extract_strided_slice %6 {offsets = [0, 24], sizes = [8, 8], strides = [1, 1]} : vector<8x32xf32> to vector<8x8xf32>
    %19 = vector.extract_strided_slice %7 {offsets = [0, 24], sizes = [8, 8], strides = [1, 1]} : vector<8x32xf32> to vector<8x8xf32>
    %cst_12 = arith.constant dense<0.000000e+00> : vector<8x8xf32>
    %20 = tpu.matmul %18, %19, %cst_12 {dimension_numbers = #tpu.dot_dimension_numbers<[1], [1], [0], [0], [0, 0, 1, 0], [], []>} : vector<8x8xf32>, vector<8x8xf32>, vector<8x8xf32> -> vector<8x8xf32>
    %21 = tpu.concatenate %11, %14, %17, %20 in 0 : vector<8x8xf32>, vector<8x8xf32>, vector<8x8xf32>, vector<8x8xf32> -> vector<32x8xf32>
    %cst_13 = arith.constant dense<0xFF800000> : vector<32xf32>
    %22 = vector.multi_reduction <maximumf>, %21, %cst_13 [1] : vector<32x8xf32> to vector<32xf32>
    %23 = vector.shape_cast %22 : vector<32xf32> to vector<32x1xf32>
    %24 = vector.broadcast %23 : vector<32x1xf32> to vector<32x8xf32>
    %25 = arith.subf %21, %24 : vector<32x8xf32>
    %26 = math.exp %25 : vector<32x8xf32>
    %cst_14 = arith.constant dense<0.000000e+00> : vector<32xf32>
    %27 = vector.multi_reduction <add>, %26, %cst_14 [1] : vector<32x8xf32> to vector<32xf32>
    %28 = vector.shape_cast %27 : vector<32xf32> to vector<32x1xf32>
    %29 = vector.broadcast %28 : vector<32x1xf32> to vector<32x8xf32>
    %30 = arith.divf %26, %29 : vector<32x8xf32>
    %31 = vector.extract_strided_slice %30 {offsets = [0, 0], sizes = [8, 8], strides = [1, 1]} : vector<32x8xf32> to vector<8x8xf32>
    %32 = vector.extract_strided_slice %8 {offsets = [0, 0], sizes = [8, 8], strides = [1, 1]} : vector<8x32xf32> to vector<8x8xf32>
    %cst_15 = arith.constant dense<0.000000e+00> : vector<8x8xf32>
    %33 = tpu.matmul %31, %32, %cst_15 {dimension_numbers = #tpu.dot_dimension_numbers<[1], [0], [0], [1], [0, 0, 1, 1], [], []>} : vector<8x8xf32>, vector<8x8xf32>, vector<8x8xf32> -> vector<8x8xf32>
    %c0_16 = arith.constant 0 : index
    %c0_17 = arith.constant 0 : index
    %34 = vector.load %arg8[%c0_16, %c0_17] : memref<32x32xf32, #tpu.memory_space<vmem>>, vector<8x32xf32>
    %cst_18 = arith.constant dense<0.000000e+00> : vector<8x32xf32>
    %35 = tpu.matmul %33, %34, %cst_18 {dimension_numbers = #tpu.dot_dimension_numbers<[1], [0], [0], [1], [0, 0, 1, 1], [], []>} : vector<8x8xf32>, vector<8x32xf32>, vector<8x32xf32> -> vector<8x32xf32>
    %36 = vector.extract_strided_slice %30 {offsets = [8, 0], sizes = [8, 8], strides = [1, 1]} : vector<32x8xf32> to vector<8x8xf32>
    %37 = vector.extract_strided_slice %8 {offsets = [0, 8], sizes = [8, 8], strides = [1, 1]} : vector<8x32xf32> to vector<8x8xf32>
    %cst_19 = arith.constant dense<0.000000e+00> : vector<8x8xf32>
    %38 = tpu.matmul %36, %37, %cst_19 {dimension_numbers = #tpu.dot_dimension_numbers<[1], [0], [0], [1], [0, 0, 1, 1], [], []>} : vector<8x8xf32>, vector<8x8xf32>, vector<8x8xf32> -> vector<8x8xf32>
    %c8 = arith.constant 8 : index
    %c0_20 = arith.constant 0 : index
    %39 = vector.load %arg8[%c8, %c0_20] : memref<32x32xf32, #tpu.memory_space<vmem>>, vector<8x32xf32>
    %cst_21 = arith.constant dense<0.000000e+00> : vector<8x32xf32>
    %40 = tpu.matmul %38, %39, %cst_21 {dimension_numbers = #tpu.dot_dimension_numbers<[1], [0], [0], [1], [0, 0, 1, 1], [], []>} : vector<8x8xf32>, vector<8x32xf32>, vector<8x32xf32> -> vector<8x32xf32>
    %41 = arith.addf %35, %40 : vector<8x32xf32>
    %42 = vector.extract_strided_slice %30 {offsets = [16, 0], sizes = [8, 8], strides = [1, 1]} : vector<32x8xf32> to vector<8x8xf32>
    %43 = vector.extract_strided_slice %8 {offsets = [0, 16], sizes = [8, 8], strides = [1, 1]} : vector<8x32xf32> to vector<8x8xf32>
    %cst_22 = arith.constant dense<0.000000e+00> : vector<8x8xf32>
    %44 = tpu.matmul %42, %43, %cst_22 {dimension_numbers = #tpu.dot_dimension_numbers<[1], [0], [0], [1], [0, 0, 1, 1], [], []>} : vector<8x8xf32>, vector<8x8xf32>, vector<8x8xf32> -> vector<8x8xf32>
    %c16 = arith.constant 16 : index
    %c0_23 = arith.constant 0 : index
    %45 = vector.load %arg8[%c16, %c0_23] : memref<32x32xf32, #tpu.memory_space<vmem>>, vector<8x32xf32>
    %cst_24 = arith.constant dense<0.000000e+00> : vector<8x32xf32>
    %46 = tpu.matmul %44, %45, %cst_24 {dimension_numbers = #tpu.dot_dimension_numbers<[1], [0], [0], [1], [0, 0, 1, 1], [], []>} : vector<8x8xf32>, vector<8x32xf32>, vector<8x32xf32> -> vector<8x32xf32>
    %47 = arith.addf %41, %46 : vector<8x32xf32>
    %48 = vector.extract_strided_slice %30 {offsets = [24, 0], sizes = [8, 8], strides = [1, 1]} : vector<32x8xf32> to vector<8x8xf32>
    %49 = vector.extract_strided_slice %8 {offsets = [0, 24], sizes = [8, 8], strides = [1, 1]} : vector<8x32xf32> to vector<8x8xf32>
    %cst_25 = arith.constant dense<0.000000e+00> : vector<8x8xf32>
    %50 = tpu.matmul %48, %49, %cst_25 {dimension_numbers = #tpu.dot_dimension_numbers<[1], [0], [0], [1], [0, 0, 1, 1], [], []>} : vector<8x8xf32>, vector<8x8xf32>, vector<8x8xf32> -> vector<8x8xf32>
    %c24 = arith.constant 24 : index
    %c0_26 = arith.constant 0 : index
    %51 = vector.load %arg8[%c24, %c0_26] : memref<32x32xf32, #tpu.memory_space<vmem>>, vector<8x32xf32>
    %cst_27 = arith.constant dense<0.000000e+00> : vector<8x32xf32>
    %52 = tpu.matmul %50, %51, %cst_27 {dimension_numbers = #tpu.dot_dimension_numbers<[1], [0], [0], [1], [0, 0, 1, 1], [], []>} : vector<8x8xf32>, vector<8x32xf32>, vector<8x32xf32> -> vector<8x32xf32>
    %53 = arith.addf %47, %52 : vector<8x32xf32>
    %c0_28 = arith.constant 0 : index
    %c0_29 = arith.constant 0 : index
    %54 = vector.load %arg9[%c0_28, %c0_29] : memref<1x32xf32, #tpu.memory_space<vmem>>, vector<1x32xf32>
    %55 = vector.broadcast %54 : vector<1x32xf32> to vector<8x32xf32>
    %56 = arith.addf %53, %55 : vector<8x32xf32>
    %57 = arith.addf %1, %56 : vector<8x32xf32>
    %cst_30 = arith.constant dense<0.000000e+00> : vector<8xf32>
    %58 = vector.multi_reduction <add>, %57, %cst_30 [1] : vector<8x32xf32> to vector<8xf32>
    %59 = vector.shape_cast %58 : vector<8xf32> to vector<8x1xf32>
    %cst_31 = arith.constant 3.200000e+01 : f32
    %60 = vector.broadcast %cst_31 : f32 to vector<8x1xf32>
    %61 = arith.divf %59, %60 : vector<8x1xf32>
    %62 = arith.mulf %57, %57 : vector<8x32xf32>
    %cst_32 = arith.constant dense<0.000000e+00> : vector<8xf32>
    %63 = vector.multi_reduction <add>, %62, %cst_32 [1] : vector<8x32xf32> to vector<8xf32>
    %64 = vector.shape_cast %63 : vector<8xf32> to vector<8x1xf32>
    %cst_33 = arith.constant 3.200000e+01 : f32
    %65 = vector.broadcast %cst_33 : f32 to vector<8x1xf32>
    %66 = arith.divf %64, %65 : vector<8x1xf32>
    %67 = arith.mulf %61, %61 : vector<8x1xf32>
    %68 = arith.subf %66, %67 : vector<8x1xf32>
    %69 = vector.broadcast %61 : vector<8x1xf32> to vector<8x32xf32>
    %70 = arith.subf %57, %69 : vector<8x32xf32>
    %cst_34 = arith.constant 9.99999974E-6 : f32
    %71 = vector.broadcast %cst_34 : f32 to vector<8x1xf32>
    %72 = arith.addf %68, %71 : vector<8x1xf32>
    %73 = math.rsqrt %72 : vector<8x1xf32>
    %74 = vector.broadcast %73 : vector<8x1xf32> to vector<8x32xf32>
    %75 = arith.mulf %70, %74 : vector<8x32xf32>
    %c0_35 = arith.constant 0 : index
    %c0_36 = arith.constant 0 : index
    %c0_37 = arith.constant 0 : index
    %76 = vector.load %arg17[%c0_35, %c0_36, %c0_37] : memref<3x1x32xf32, #tpu.memory_space<vmem>>, vector<1x1x32xf32>
    %77 = vector.shape_cast %76 : vector<1x1x32xf32> to vector<1x32xf32>
    %78 = vector.broadcast %77 : vector<1x32xf32> to vector<8x32xf32>
    %79 = arith.mulf %75, %78 : vector<8x32xf32>
    %c0_38 = arith.constant 0 : index
    %c0_39 = arith.constant 0 : index
    %c0_40 = arith.constant 0 : index
    %80 = vector.load %arg18[%c0_38, %c0_39, %c0_40] : memref<3x1x32xf32, #tpu.memory_space<vmem>>, vector<1x1x32xf32>
    %81 = vector.shape_cast %80 : vector<1x1x32xf32> to vector<1x32xf32>
    %82 = vector.broadcast %81 : vector<1x32xf32> to vector<8x32xf32>
    %83 = arith.addf %79, %82 : vector<8x32xf32>
    %84 = tpu.concatenate %83, %3 in 1 : vector<8x32xf32>, vector<8x32xf32> -> vector<8x64xf32>
    %c0_41 = arith.constant 0 : index
    %c0_42 = arith.constant 0 : index
    %85 = vector.load %arg10[%c0_41, %c0_42] : memref<64x96xf32, #tpu.memory_space<vmem>>, vector<64x96xf32>
    %cst_43 = arith.constant dense<0.000000e+00> : vector<8x96xf32>
    %86 = tpu.matmul %84, %85, %cst_43 {dimension_numbers = #tpu.dot_dimension_numbers<[1], [0], [0], [1], [0, 0, 1, 1], [], []>} : vector<8x64xf32>, vector<64x96xf32>, vector<8x96xf32> -> vector<8x96xf32>
    %c0_44 = arith.constant 0 : index
    %87 = memref.load %arg20[%c0_44] : memref<4xf32, #tpu.memory_space<smem>>
    %c1 = arith.constant 1 : index
    %88 = memref.load %arg20[%c1] : memref<4xf32, #tpu.memory_space<smem>>
    %c2 = arith.constant 2 : index
    %89 = memref.load %arg20[%c2] : memref<4xf32, #tpu.memory_space<smem>>
    %c3 = arith.constant 3 : index
    %90 = memref.load %arg20[%c3] : memref<4xf32, #tpu.memory_space<smem>>
    %c0_45 = arith.constant 0 : index
    %c0_46 = arith.constant 0 : index
    %91 = vector.load %arg4[%c0_45, %c0_46] : memref<8x1xf32, #tpu.memory_space<vmem>>, vector<8x1xf32>
    %c0_47 = arith.constant 0 : index
    %c0_48 = arith.constant 0 : index
    %c0_49 = arith.constant 0 : index
    %92 = vector.load %arg3[%c0_47, %c0_48, %c0_49] : memref<1x1x8xf32, #tpu.memory_space<vmem>>, vector<1x1x8xf32>
    %93 = vector.shape_cast %92 : vector<1x1x8xf32> to vector<1x8xf32>
    %94 = vector.broadcast %91 : vector<8x1xf32> to vector<8x8xf32>
    %95 = vector.broadcast %93 : vector<1x8xf32> to vector<8x8xf32>
    %96 = arith.subf %94, %95 : vector<8x8xf32>
    %97 = vector.broadcast %87 : f32 to vector<8x8xf32>
    %98 = arith.addf %96, %97 : vector<8x8xf32>
    %99 = vector.broadcast %88 : f32 to vector<8x8xf32>
    %100 = arith.divf %99, %98 : vector<8x8xf32>
    %101 = vector.broadcast %89 : f32 to vector<8x8xf32>
    %102 = arith.mulf %101, %100 : vector<8x8xf32>
    %103 = vector.broadcast %90 : f32 to vector<8x8xf32>
    %104 = arith.addf %102, %103 : vector<8x8xf32>
    %105 = vector.extract_strided_slice %86 {offsets = [0, 0], sizes = [8, 32], strides = [1, 1]} : vector<8x96xf32> to vector<8x32xf32>
    %106 = vector.extract_strided_slice %86 {offsets = [0, 32], sizes = [8, 32], strides = [1, 1]} : vector<8x96xf32> to vector<8x32xf32>
    %107 = vector.extract_strided_slice %86 {offsets = [0, 64], sizes = [8, 32], strides = [1, 1]} : vector<8x96xf32> to vector<8x32xf32>
    %108 = vector.extract_strided_slice %105 {offsets = [0, 0], sizes = [8, 8], strides = [1, 1]} : vector<8x32xf32> to vector<8x8xf32>
    %109 = vector.extract_strided_slice %106 {offsets = [0, 0], sizes = [8, 8], strides = [1, 1]} : vector<8x32xf32> to vector<8x8xf32>
    %cst_50 = arith.constant dense<0.000000e+00> : vector<8x8xf32>
    %110 = tpu.matmul %108, %109, %cst_50 {dimension_numbers = #tpu.dot_dimension_numbers<[1], [1], [0], [0], [0, 0, 1, 0], [], []>} : vector<8x8xf32>, vector<8x8xf32>, vector<8x8xf32> -> vector<8x8xf32>
    %111 = arith.mulf %110, %104 : vector<8x8xf32>
    %112 = vector.extract_strided_slice %105 {offsets = [0, 8], sizes = [8, 8], strides = [1, 1]} : vector<8x32xf32> to vector<8x8xf32>
    %113 = vector.extract_strided_slice %106 {offsets = [0, 8], sizes = [8, 8], strides = [1, 1]} : vector<8x32xf32> to vector<8x8xf32>
    %cst_51 = arith.constant dense<0.000000e+00> : vector<8x8xf32>
    %114 = tpu.matmul %112, %113, %cst_51 {dimension_numbers = #tpu.dot_dimension_numbers<[1], [1], [0], [0], [0, 0, 1, 0], [], []>} : vector<8x8xf32>, vector<8x8xf32>, vector<8x8xf32> -> vector<8x8xf32>
    %115 = arith.mulf %114, %104 : vector<8x8xf32>
    %116 = vector.extract_strided_slice %105 {offsets = [0, 16], sizes = [8, 8], strides = [1, 1]} : vector<8x32xf32> to vector<8x8xf32>
    %117 = vector.extract_strided_slice %106 {offsets = [0, 16], sizes = [8, 8], strides = [1, 1]} : vector<8x32xf32> to vector<8x8xf32>
    %cst_52 = arith.constant dense<0.000000e+00> : vector<8x8xf32>
    %118 = tpu.matmul %116, %117, %cst_52 {dimension_numbers = #tpu.dot_dimension_numbers<[1], [1], [0], [0], [0, 0, 1, 0], [], []>} : vector<8x8xf32>, vector<8x8xf32>, vector<8x8xf32> -> vector<8x8xf32>
    %119 = arith.mulf %118, %104 : vector<8x8xf32>
    %120 = vector.extract_strided_slice %105 {offsets = [0, 24], sizes = [8, 8], strides = [1, 1]} : vector<8x32xf32> to vector<8x8xf32>
    %121 = vector.extract_strided_slice %106 {offsets = [0, 24], sizes = [8, 8], strides = [1, 1]} : vector<8x32xf32> to vector<8x8xf32>
    %cst_53 = arith.constant dense<0.000000e+00> : vector<8x8xf32>
    %122 = tpu.matmul %120, %121, %cst_53 {dimension_numbers = #tpu.dot_dimension_numbers<[1], [1], [0], [0], [0, 0, 1, 0], [], []>} : vector<8x8xf32>, vector<8x8xf32>, vector<8x8xf32> -> vector<8x8xf32>
    %123 = arith.mulf %122, %104 : vector<8x8xf32>
    %124 = tpu.concatenate %111, %115, %119, %123 in 0 : vector<8x8xf32>, vector<8x8xf32>, vector<8x8xf32>, vector<8x8xf32> -> vector<32x8xf32>
    %cst_54 = arith.constant dense<0xFF800000> : vector<32xf32>
    %125 = vector.multi_reduction <maximumf>, %124, %cst_54 [1] : vector<32x8xf32> to vector<32xf32>
    %126 = vector.shape_cast %125 : vector<32xf32> to vector<32x1xf32>
    %127 = vector.broadcast %126 : vector<32x1xf32> to vector<32x8xf32>
    %128 = arith.subf %124, %127 : vector<32x8xf32>
    %129 = math.exp %128 : vector<32x8xf32>
    %cst_55 = arith.constant dense<0.000000e+00> : vector<32xf32>
    %130 = vector.multi_reduction <add>, %129, %cst_55 [1] : vector<32x8xf32> to vector<32xf32>
    %131 = vector.shape_cast %130 : vector<32xf32> to vector<32x1xf32>
    %132 = vector.broadcast %131 : vector<32x1xf32> to vector<32x8xf32>
    %133 = arith.divf %129, %132 : vector<32x8xf32>
    %134 = vector.extract_strided_slice %133 {offsets = [0, 0], sizes = [8, 8], strides = [1, 1]} : vector<32x8xf32> to vector<8x8xf32>
    %135 = vector.extract_strided_slice %107 {offsets = [0, 0], sizes = [8, 8], strides = [1, 1]} : vector<8x32xf32> to vector<8x8xf32>
    %cst_56 = arith.constant dense<0.000000e+00> : vector<8x8xf32>
    %136 = tpu.matmul %134, %135, %cst_56 {dimension_numbers = #tpu.dot_dimension_numbers<[1], [0], [0], [1], [0, 0, 1, 1], [], []>} : vector<8x8xf32>, vector<8x8xf32>, vector<8x8xf32> -> vector<8x8xf32>
    %c0_57 = arith.constant 0 : index
    %c0_58 = arith.constant 0 : index
    %137 = vector.load %arg11[%c0_57, %c0_58] : memref<32x32xf32, #tpu.memory_space<vmem>>, vector<8x32xf32>
    %cst_59 = arith.constant dense<0.000000e+00> : vector<8x32xf32>
    %138 = tpu.matmul %136, %137, %cst_59 {dimension_numbers = #tpu.dot_dimension_numbers<[1], [0], [0], [1], [0, 0, 1, 1], [], []>} : vector<8x8xf32>, vector<8x32xf32>, vector<8x32xf32> -> vector<8x32xf32>
    %139 = vector.extract_strided_slice %133 {offsets = [8, 0], sizes = [8, 8], strides = [1, 1]} : vector<32x8xf32> to vector<8x8xf32>
    %140 = vector.extract_strided_slice %107 {offsets = [0, 8], sizes = [8, 8], strides = [1, 1]} : vector<8x32xf32> to vector<8x8xf32>
    %cst_60 = arith.constant dense<0.000000e+00> : vector<8x8xf32>
    %141 = tpu.matmul %139, %140, %cst_60 {dimension_numbers = #tpu.dot_dimension_numbers<[1], [0], [0], [1], [0, 0, 1, 1], [], []>} : vector<8x8xf32>, vector<8x8xf32>, vector<8x8xf32> -> vector<8x8xf32>
    %c8_61 = arith.constant 8 : index
    %c0_62 = arith.constant 0 : index
    %142 = vector.load %arg11[%c8_61, %c0_62] : memref<32x32xf32, #tpu.memory_space<vmem>>, vector<8x32xf32>
    %cst_63 = arith.constant dense<0.000000e+00> : vector<8x32xf32>
    %143 = tpu.matmul %141, %142, %cst_63 {dimension_numbers = #tpu.dot_dimension_numbers<[1], [0], [0], [1], [0, 0, 1, 1], [], []>} : vector<8x8xf32>, vector<8x32xf32>, vector<8x32xf32> -> vector<8x32xf32>
    %144 = arith.addf %138, %143 : vector<8x32xf32>
    %145 = vector.extract_strided_slice %133 {offsets = [16, 0], sizes = [8, 8], strides = [1, 1]} : vector<32x8xf32> to vector<8x8xf32>
    %146 = vector.extract_strided_slice %107 {offsets = [0, 16], sizes = [8, 8], strides = [1, 1]} : vector<8x32xf32> to vector<8x8xf32>
    %cst_64 = arith.constant dense<0.000000e+00> : vector<8x8xf32>
    %147 = tpu.matmul %145, %146, %cst_64 {dimension_numbers = #tpu.dot_dimension_numbers<[1], [0], [0], [1], [0, 0, 1, 1], [], []>} : vector<8x8xf32>, vector<8x8xf32>, vector<8x8xf32> -> vector<8x8xf32>
    %c16_65 = arith.constant 16 : index
    %c0_66 = arith.constant 0 : index
    %148 = vector.load %arg11[%c16_65, %c0_66] : memref<32x32xf32, #tpu.memory_space<vmem>>, vector<8x32xf32>
    %cst_67 = arith.constant dense<0.000000e+00> : vector<8x32xf32>
    %149 = tpu.matmul %147, %148, %cst_67 {dimension_numbers = #tpu.dot_dimension_numbers<[1], [0], [0], [1], [0, 0, 1, 1], [], []>} : vector<8x8xf32>, vector<8x32xf32>, vector<8x32xf32> -> vector<8x32xf32>
    %150 = arith.addf %144, %149 : vector<8x32xf32>
    %151 = vector.extract_strided_slice %133 {offsets = [24, 0], sizes = [8, 8], strides = [1, 1]} : vector<32x8xf32> to vector<8x8xf32>
    %152 = vector.extract_strided_slice %107 {offsets = [0, 24], sizes = [8, 8], strides = [1, 1]} : vector<8x32xf32> to vector<8x8xf32>
    %cst_68 = arith.constant dense<0.000000e+00> : vector<8x8xf32>
    %153 = tpu.matmul %151, %152, %cst_68 {dimension_numbers = #tpu.dot_dimension_numbers<[1], [0], [0], [1], [0, 0, 1, 1], [], []>} : vector<8x8xf32>, vector<8x8xf32>, vector<8x8xf32> -> vector<8x8xf32>
    %c24_69 = arith.constant 24 : index
    %c0_70 = arith.constant 0 : index
    %154 = vector.load %arg11[%c24_69, %c0_70] : memref<32x32xf32, #tpu.memory_space<vmem>>, vector<8x32xf32>
    %cst_71 = arith.constant dense<0.000000e+00> : vector<8x32xf32>
    %155 = tpu.matmul %153, %154, %cst_71 {dimension_numbers = #tpu.dot_dimension_numbers<[1], [0], [0], [1], [0, 0, 1, 1], [], []>} : vector<8x8xf32>, vector<8x32xf32>, vector<8x32xf32> -> vector<8x32xf32>
    %156 = arith.addf %150, %155 : vector<8x32xf32>
    %c0_72 = arith.constant 0 : index
    %c0_73 = arith.constant 0 : index
    %157 = vector.load %arg12[%c0_72, %c0_73] : memref<1x32xf32, #tpu.memory_space<vmem>>, vector<1x32xf32>
    %158 = vector.broadcast %157 : vector<1x32xf32> to vector<8x32xf32>
    %159 = arith.addf %156, %158 : vector<8x32xf32>
    %c0_74 = arith.constant 0 : index
    %160 = memref.load %arg19[%c0_74] : memref<8xf32, #tpu.memory_space<smem>>
    %c1_75 = arith.constant 1 : index
    %161 = memref.load %arg19[%c1_75] : memref<8xf32, #tpu.memory_space<smem>>
    %c2_76 = arith.constant 2 : index
    %162 = memref.load %arg19[%c2_76] : memref<8xf32, #tpu.memory_space<smem>>
    %c3_77 = arith.constant 3 : index
    %163 = memref.load %arg19[%c3_77] : memref<8xf32, #tpu.memory_space<smem>>
    %c4 = arith.constant 4 : index
    %164 = memref.load %arg19[%c4] : memref<8xf32, #tpu.memory_space<smem>>
    %c5 = arith.constant 5 : index
    %165 = memref.load %arg19[%c5] : memref<8xf32, #tpu.memory_space<smem>>
    %c6 = arith.constant 6 : index
    %166 = memref.load %arg19[%c6] : memref<8xf32, #tpu.memory_space<smem>>
    %c0_78 = arith.constant 0 : index
    %c0_79 = arith.constant 0 : index
    %167 = vector.load %arg6[%c0_78, %c0_79] : memref<8x1xf32, #tpu.memory_space<vmem>>, vector<8x1xf32>
    %168 = vector.broadcast %160 : f32 to vector<8x1xf32>
    %169 = arith.mulf %167, %168 : vector<8x1xf32>
    %170 = vector.broadcast %161 : f32 to vector<8x1xf32>
    %171 = arith.addf %169, %170 : vector<8x1xf32>
    %cst_80 = arith.constant 0.000000e+00 : f32
    %172 = vector.broadcast %cst_80 : f32 to vector<8x1xf32>
    %173 = arith.maximumf %171, %172 : vector<8x1xf32>
    %c0_81 = arith.constant 0 : index
    %c0_82 = arith.constant 0 : index
    %174 = vector.load %arg5[%c0_81, %c0_82] : memref<8x1xf32, #tpu.memory_space<vmem>>, vector<8x1xf32>
    %175 = vector.broadcast %162 : f32 to vector<8x1xf32>
    %176 = arith.mulf %174, %175 : vector<8x1xf32>
    %177 = vector.broadcast %163 : f32 to vector<8x1xf32>
    %178 = arith.addf %176, %177 : vector<8x1xf32>
    %cst_83 = arith.constant 0.000000e+00 : f32
    %179 = vector.broadcast %cst_83 : f32 to vector<8x1xf32>
    %180 = arith.maximumf %178, %179 : vector<8x1xf32>
    %cst_84 = arith.constant 1.000000e+00 : f32
    %181 = vector.broadcast %cst_84 : f32 to vector<8x1xf32>
    %182 = arith.addf %180, %181 : vector<8x1xf32>
    %183 = arith.divf %173, %182 : vector<8x1xf32>
    %184 = vector.broadcast %164 : f32 to vector<8x1xf32>
    %185 = arith.mulf %184, %183 : vector<8x1xf32>
    %cst_85 = arith.constant 0.000000e+00 : f32
    %186 = vector.broadcast %cst_85 : f32 to vector<8x1xf32>
    %187 = arith.subf %186, %185 : vector<8x1xf32>
    %188 = math.exp %187 : vector<8x1xf32>
    %cst_86 = arith.constant 1.000000e+00 : f32
    %189 = vector.broadcast %cst_86 : f32 to vector<8x1xf32>
    %190 = arith.addf %189, %188 : vector<8x1xf32>
    %cst_87 = arith.constant 1.000000e+00 : f32
    %191 = vector.broadcast %cst_87 : f32 to vector<8x1xf32>
    %192 = arith.divf %191, %190 : vector<8x1xf32>
    %cst_88 = arith.constant 2.000000e+00 : f32
    %193 = arith.mulf %cst_88, %165 : f32
    %194 = vector.broadcast %166 : f32 to vector<8x1xf32>
    %195 = arith.addf %192, %194 : vector<8x1xf32>
    %196 = vector.broadcast %193 : f32 to vector<8x1xf32>
    %197 = arith.mulf %196, %195 : vector<8x1xf32>
    %cst_89 = arith.constant 1.000000e+00 : f32
    %198 = vector.broadcast %cst_89 : f32 to vector<8x1xf32>
    %199 = arith.addf %198, %197 : vector<8x1xf32>
    %200 = vector.broadcast %199 : vector<8x1xf32> to vector<8x32xf32>
    %201 = arith.mulf %159, %200 : vector<8x32xf32>
    %202 = arith.addf %83, %201 : vector<8x32xf32>
    %cst_90 = arith.constant dense<0.000000e+00> : vector<8xf32>
    %203 = vector.multi_reduction <add>, %202, %cst_90 [1] : vector<8x32xf32> to vector<8xf32>
    %204 = vector.shape_cast %203 : vector<8xf32> to vector<8x1xf32>
    %cst_91 = arith.constant 3.200000e+01 : f32
    %205 = vector.broadcast %cst_91 : f32 to vector<8x1xf32>
    %206 = arith.divf %204, %205 : vector<8x1xf32>
    %207 = arith.mulf %202, %202 : vector<8x32xf32>
    %cst_92 = arith.constant dense<0.000000e+00> : vector<8xf32>
    %208 = vector.multi_reduction <add>, %207, %cst_92 [1] : vector<8x32xf32> to vector<8xf32>
    %209 = vector.shape_cast %208 : vector<8xf32> to vector<8x1xf32>
    %cst_93 = arith.constant 3.200000e+01 : f32
    %210 = vector.broadcast %cst_93 : f32 to vector<8x1xf32>
    %211 = arith.divf %209, %210 : vector<8x1xf32>
    %212 = arith.mulf %206, %206 : vector<8x1xf32>
    %213 = arith.subf %211, %212 : vector<8x1xf32>
    %214 = vector.broadcast %206 : vector<8x1xf32> to vector<8x32xf32>
    %215 = arith.subf %202, %214 : vector<8x32xf32>
    %cst_94 = arith.constant 9.99999974E-6 : f32
    %216 = vector.broadcast %cst_94 : f32 to vector<8x1xf32>
    %217 = arith.addf %213, %216 : vector<8x1xf32>
    %218 = math.rsqrt %217 : vector<8x1xf32>
    %219 = vector.broadcast %218 : vector<8x1xf32> to vector<8x32xf32>
    %220 = arith.mulf %215, %219 : vector<8x32xf32>
    %c1_95 = arith.constant 1 : index
    %c0_96 = arith.constant 0 : index
    %c0_97 = arith.constant 0 : index
    %221 = vector.load %arg17[%c1_95, %c0_96, %c0_97] : memref<3x1x32xf32, #tpu.memory_space<vmem>>, vector<1x1x32xf32>
    %222 = vector.shape_cast %221 : vector<1x1x32xf32> to vector<1x32xf32>
    %223 = vector.broadcast %222 : vector<1x32xf32> to vector<8x32xf32>
    %224 = arith.mulf %220, %223 : vector<8x32xf32>
    %c1_98 = arith.constant 1 : index
    %c0_99 = arith.constant 0 : index
    %c0_100 = arith.constant 0 : index
    %225 = vector.load %arg18[%c1_98, %c0_99, %c0_100] : memref<3x1x32xf32, #tpu.memory_space<vmem>>, vector<1x1x32xf32>
    %226 = vector.shape_cast %225 : vector<1x1x32xf32> to vector<1x32xf32>
    %227 = vector.broadcast %226 : vector<1x32xf32> to vector<8x32xf32>
    %228 = arith.addf %224, %227 : vector<8x32xf32>
    %c0_101 = arith.constant 0 : index
    %c0_102 = arith.constant 0 : index
    %229 = vector.load %arg13[%c0_101, %c0_102] : memref<32x64xf32, #tpu.memory_space<vmem>>, vector<32x64xf32>
    %cst_103 = arith.constant dense<0.000000e+00> : vector<8x64xf32>
    %230 = tpu.matmul %228, %229, %cst_103 {dimension_numbers = #tpu.dot_dimension_numbers<[1], [0], [0], [1], [0, 0, 1, 1], [], []>} : vector<8x32xf32>, vector<32x64xf32>, vector<8x64xf32> -> vector<8x64xf32>
    %c0_104 = arith.constant 0 : index
    %c0_105 = arith.constant 0 : index
    %231 = vector.load %arg14[%c0_104, %c0_105] : memref<1x64xf32, #tpu.memory_space<vmem>>, vector<1x64xf32>
    %232 = vector.broadcast %231 : vector<1x64xf32> to vector<8x64xf32>
    %233 = arith.addf %230, %232 : vector<8x64xf32>
    %cst_106 = arith.constant 0.000000e+00 : f32
    %234 = vector.broadcast %cst_106 : f32 to vector<8x64xf32>
    %235 = arith.maximumf %233, %234 : vector<8x64xf32>
    %c0_107 = arith.constant 0 : index
    %c0_108 = arith.constant 0 : index
    %236 = vector.load %arg15[%c0_107, %c0_108] : memref<64x32xf32, #tpu.memory_space<vmem>>, vector<64x32xf32>
    %cst_109 = arith.constant dense<0.000000e+00> : vector<8x32xf32>
    %237 = tpu.matmul %235, %236, %cst_109 {dimension_numbers = #tpu.dot_dimension_numbers<[1], [0], [0], [1], [0, 0, 1, 1], [], []>} : vector<8x64xf32>, vector<64x32xf32>, vector<8x32xf32> -> vector<8x32xf32>
    %c0_110 = arith.constant 0 : index
    %c0_111 = arith.constant 0 : index
    %238 = vector.load %arg16[%c0_110, %c0_111] : memref<1x32xf32, #tpu.memory_space<vmem>>, vector<1x32xf32>
    %239 = vector.broadcast %238 : vector<1x32xf32> to vector<8x32xf32>
    %240 = arith.addf %237, %239 : vector<8x32xf32>
    %241 = arith.addf %228, %240 : vector<8x32xf32>
    %cst_112 = arith.constant dense<0.000000e+00> : vector<8xf32>
    %242 = vector.multi_reduction <add>, %241, %cst_112 [1] : vector<8x32xf32> to vector<8xf32>
    %243 = vector.shape_cast %242 : vector<8xf32> to vector<8x1xf32>
    %cst_113 = arith.constant 3.200000e+01 : f32
    %244 = vector.broadcast %cst_113 : f32 to vector<8x1xf32>
    %245 = arith.divf %243, %244 : vector<8x1xf32>
    %246 = arith.mulf %241, %241 : vector<8x32xf32>
    %cst_114 = arith.constant dense<0.000000e+00> : vector<8xf32>
    %247 = vector.multi_reduction <add>, %246, %cst_114 [1] : vector<8x32xf32> to vector<8xf32>
    %248 = vector.shape_cast %247 : vector<8xf32> to vector<8x1xf32>
    %cst_115 = arith.constant 3.200000e+01 : f32
    %249 = vector.broadcast %cst_115 : f32 to vector<8x1xf32>
    %250 = arith.divf %248, %249 : vector<8x1xf32>
    %251 = arith.mulf %245, %245 : vector<8x1xf32>
    %252 = arith.subf %250, %251 : vector<8x1xf32>
    %253 = vector.broadcast %245 : vector<8x1xf32> to vector<8x32xf32>
    %254 = arith.subf %241, %253 : vector<8x32xf32>
    %cst_116 = arith.constant 9.99999974E-6 : f32
    %255 = vector.broadcast %cst_116 : f32 to vector<8x1xf32>
    %256 = arith.addf %252, %255 : vector<8x1xf32>
    %257 = math.rsqrt %256 : vector<8x1xf32>
    %258 = vector.broadcast %257 : vector<8x1xf32> to vector<8x32xf32>
    %259 = arith.mulf %254, %258 : vector<8x32xf32>
    %c2_117 = arith.constant 2 : index
    %c0_118 = arith.constant 0 : index
    %c0_119 = arith.constant 0 : index
    %260 = vector.load %arg17[%c2_117, %c0_118, %c0_119] : memref<3x1x32xf32, #tpu.memory_space<vmem>>, vector<1x1x32xf32>
    %261 = vector.shape_cast %260 : vector<1x1x32xf32> to vector<1x32xf32>
    %262 = vector.broadcast %261 : vector<1x32xf32> to vector<8x32xf32>
    %263 = arith.mulf %259, %262 : vector<8x32xf32>
    %c2_120 = arith.constant 2 : index
    %c0_121 = arith.constant 0 : index
    %c0_122 = arith.constant 0 : index
    %264 = vector.load %arg18[%c2_120, %c0_121, %c0_122] : memref<3x1x32xf32, #tpu.memory_space<vmem>>, vector<1x1x32xf32>
    %265 = vector.shape_cast %264 : vector<1x1x32xf32> to vector<1x32xf32>
    %266 = vector.broadcast %265 : vector<1x32xf32> to vector<8x32xf32>
    %267 = arith.addf %263, %266 : vector<8x32xf32>
    %c0_123 = arith.constant 0 : index
    %c0_124 = arith.constant 0 : index
    %c0_125 = arith.constant 0 : index
    %c0_126 = arith.constant 0 : index
    %268 = vector.load %arg21[%c0_123, %c0_124, %c0_125, %c0_126] : memref<8x1x1x32xf32, #tpu.memory_space<vmem>>, vector<8x1x1x32xf32>
    %269 = vector.shape_cast %268 : vector<8x1x1x32xf32> to vector<8x32xf32>
    %270 = vector.shape_cast %267 : vector<8x32xf32> to vector<8x1x1x32xf32>
    tpu.vector_store %arg21[%c0_123, %c0_124, %c0_125, %c0_126], %270 {strides = array<i32>} : memref<8x1x1x32xf32, #tpu.memory_space<vmem>>, vector<8x1x1x32xf32>,
    return
  }
  func.func @transform_0(%arg0: i32) -> (i32, i32, i32, i32) {
    %c0_i32 = arith.constant 0 : i32
    %c0_i32_0 = arith.constant 0 : i32
    %c0_i32_1 = arith.constant 0 : i32
    %c0_i32_2 = arith.constant 0 : i32
    return %c0_i32, %arg0, %c0_i32_0, %c0_i32_1 : i32, i32, i32, i32
  }
  func.func @transform_1(%arg0: i32) -> (i32, i32, i32, i32) {
    %c0_i32 = arith.constant 0 : i32
    %c0_i32_0 = arith.constant 0 : i32
    %c0_i32_1 = arith.constant 0 : i32
    %c0_i32_2 = arith.constant 0 : i32
    return %c0_i32, %arg0, %c0_i32_0, %c0_i32_1 : i32, i32, i32, i32
  }
  func.func @transform_2(%arg0: i32) -> (i32, i32, i32) {
    %c0_i32 = arith.constant 0 : i32
    %c0_i32_0 = arith.constant 0 : i32
    %c0_i32_1 = arith.constant 0 : i32
    return %arg0, %c0_i32, %c0_i32_0 : i32, i32, i32
  }
  func.func @transform_3(%arg0: i32) -> (i32, i32) {
    %c0_i32 = arith.constant 0 : i32
    %c0_i32_0 = arith.constant 0 : i32
    return %arg0, %c0_i32 : i32, i32
  }
  func.func @transform_4(%arg0: i32) -> (i32, i32) {
    %c0_i32 = arith.constant 0 : i32
    %c0_i32_0 = arith.constant 0 : i32
    return %arg0, %c0_i32 : i32, i32
  }
  func.func @transform_5(%arg0: i32) -> (i32, i32) {
    %c0_i32 = arith.constant 0 : i32
    %c0_i32_0 = arith.constant 0 : i32
    return %arg0, %c0_i32 : i32, i32
  }
  func.func @transform_6(%arg0: i32) -> (i32, i32) {
    %c0_i32 = arith.constant 0 : i32
    %c0_i32_0 = arith.constant 0 : i32
    %c0_i32_1 = arith.constant 0 : i32
    return %c0_i32, %c0_i32_0 : i32, i32
  }
  func.func @transform_7(%arg0: i32) -> (i32, i32) {
    %c0_i32 = arith.constant 0 : i32
    %c0_i32_0 = arith.constant 0 : i32
    %c0_i32_1 = arith.constant 0 : i32
    return %c0_i32, %c0_i32_0 : i32, i32
  }
  func.func @transform_8(%arg0: i32) -> (i32, i32) {
    %c0_i32 = arith.constant 0 : i32
    %c0_i32_0 = arith.constant 0 : i32
    %c0_i32_1 = arith.constant 0 : i32
    return %c0_i32, %c0_i32_0 : i32, i32
  }
  func.func @transform_9(%arg0: i32) -> (i32, i32) {
    %c0_i32 = arith.constant 0 : i32
    %c0_i32_0 = arith.constant 0 : i32
    %c0_i32_1 = arith.constant 0 : i32
    return %c0_i32, %c0_i32_0 : i32, i32
  }
  func.func @transform_10(%arg0: i32) -> (i32, i32) {
    %c0_i32 = arith.constant 0 : i32
    %c0_i32_0 = arith.constant 0 : i32
    %c0_i32_1 = arith.constant 0 : i32
    return %c0_i32, %c0_i32_0 : i32, i32
  }
  func.func @transform_11(%arg0: i32) -> (i32, i32) {
    %c0_i32 = arith.constant 0 : i32
    %c0_i32_0 = arith.constant 0 : i32
    %c0_i32_1 = arith.constant 0 : i32
    return %c0_i32, %c0_i32_0 : i32, i32
  }
  func.func @transform_12(%arg0: i32) -> (i32, i32) {
    %c0_i32 = arith.constant 0 : i32
    %c0_i32_0 = arith.constant 0 : i32
    %c0_i32_1 = arith.constant 0 : i32
    return %c0_i32, %c0_i32_0 : i32, i32
  }
  func.func @transform_13(%arg0: i32) -> (i32, i32) {
    %c0_i32 = arith.constant 0 : i32
    %c0_i32_0 = arith.constant 0 : i32
    %c0_i32_1 = arith.constant 0 : i32
    return %c0_i32, %c0_i32_0 : i32, i32
  }
  func.func @transform_14(%arg0: i32) -> (i32, i32) {
    %c0_i32 = arith.constant 0 : i32
    %c0_i32_0 = arith.constant 0 : i32
    %c0_i32_1 = arith.constant 0 : i32
    return %c0_i32, %c0_i32_0 : i32, i32
  }
  func.func @transform_15(%arg0: i32) -> (i32, i32) {
    %c0_i32 = arith.constant 0 : i32
    %c0_i32_0 = arith.constant 0 : i32
    %c0_i32_1 = arith.constant 0 : i32
    return %c0_i32, %c0_i32_0 : i32, i32
  }
  func.func @transform_16(%arg0: i32) -> (i32, i32, i32) {
    %c0_i32 = arith.constant 0 : i32
    %c0_i32_0 = arith.constant 0 : i32
    %c0_i32_1 = arith.constant 0 : i32
    %c0_i32_2 = arith.constant 0 : i32
    return %c0_i32, %c0_i32_0, %c0_i32_1 : i32, i32, i32
  }
  func.func @transform_17(%arg0: i32) -> (i32, i32, i32) {
    %c0_i32 = arith.constant 0 : i32
    %c0_i32_0 = arith.constant 0 : i32
    %c0_i32_1 = arith.constant 0 : i32
    %c0_i32_2 = arith.constant 0 : i32
    return %c0_i32, %c0_i32_0, %c0_i32_1 : i32, i32, i32
  }
  func.func @transform_18(%arg0: i32) -> i32 {
    %c0_i32 = arith.constant 0 : i32
    %c0_i32_0 = arith.constant 0 : i32
    return %c0_i32 : i32
  }
  func.func @transform_19(%arg0: i32) -> i32 {
    %c0_i32 = arith.constant 0 : i32
    %c0_i32_0 = arith.constant 0 : i32
    return %c0_i32 : i32
  }
  func.func @transform_20(%arg0: i32) -> (i32, i32, i32, i32) {
    %c0_i32 = arith.constant 0 : i32
    %c0_i32_0 = arith.constant 0 : i32
    %c0_i32_1 = arith.constant 0 : i32
    %c0_i32_2 = arith.constant 0 : i32
    return %c0_i32, %arg0, %c0_i32_0, %c0_i32_1 : i32, i32, i32, i32
  }
}

</mosaic_0001>

<bundles_post_ra>
// kernel: tpu_custom_call.1
= control target key start
LH: loop header
LB: loop body
LE: loop exit
PB: predicated region body
PF: predicated region fallthrough
CT: control target
= control target key end

     0   :  { %s7100_s0 = inlined_call_operand.hbm [shape: f32[8,2,1,32], index: 0, kind: input, shape index: {}]   ;;  %s7101_s1 = inlined_call_operand.hbm [shape: f32[8,2,1,32], index: 1, kind: input, shape index: {}]   ;;  %s7102_s2 = inlined_call_operand.hbm [shape: f32[2,1,8], index: 2, kind: input, shape index: {}]   ;;  %s7103_s3 = inlined_call_operand.vmem [shape: f32[16,1], index: 3, kind: input, shape index: {}]   ;;  %s7104_s4 = inlined_call_operand.vmem [shape: f32[16,1], index: 4, kind: input, shape index: {}]   ;;  %s7105_s5 = inlined_call_operand.vmem [shape: f32[16,1], index: 5, kind: input, shape index: {}]   ;;  %s7106_s6 = inlined_call_operand.vmem [shape: f32[32,96], index: 6, kind: input, shape index: {}]   ;;  %s7107_s7 = inlined_call_operand.vmem [shape: f32[32,32], index: 7, kind: input, shape index: {}]   ;;  %s7108_s8 = inlined_call_operand.hbm [shape: f32[1,32], index: 8, kind: input, shape index: {}]   ;;  %s7109_s9 = inlined_call_operand.vmem [shape: f32[64,96], index: 9, kind: input, shape index: {}]   ;;  %s7110_s10 = inlined_call_operand.hbm [shape: f32[32,32], index: 10, kind: input, shape index: {}]   ;;  %s7111_s11 = inlined_call_operand.hbm [shape: f32[1,32], index: 11, kind: input, shape index: {}]   ;;  %s7112_s12 = inlined_call_operand.vmem [shape: f32[32,64], index: 12, kind: input, shape index: {}]   ;;  %s7113_s13 = inlined_call_operand.vmem [shape: f32[1,64], index: 13, kind: input, shape index: {}]   ;;  %s7114_s14 = inlined_call_operand.vmem [shape: f32[64,32], index: 14, kind: input, shape index: {}]   ;;  %s7115_s15 = inlined_call_operand.vmem [shape: f32[1,32], index: 15, kind: input, shape index: {}]   ;;  %s7116_s16 = inlined_call_operand.vmem [shape: f32[3,1,32], index: 16, kind: input, shape index: {}]   ;;  %s7117_s17 = inlined_call_operand.vmem [shape: f32[3,1,32], index: 17, kind: input, shape index: {}]   ;;  %s7118_s18 = inlined_call_operand.vmem [shape: f32[8], index: 18, kind: input, shape index: {}]   ;;  %s7119_s19 = inlined_call_operand.vmem [shape: f32[4], index: 19, kind: input, shape index: {}]   ;;  %s7120_s20 = inlined_call_operand.hbm [shape: f32[8,2,1,32], index: 20, kind: output, shape index: {}]  }
   0x1   :  { %7161 = sst [smem:[#allocation32_spill]] %s7100_s0 }
   0x2   :  { %7162 = sst [smem:[#allocation33_spill]] %s7101_s1 }
   0x3   :  { %7163 = sst [smem:[#allocation34_spill]] %s7102_s2 }
   0x4   :  { %7164 = sst [smem:[#allocation35_spill]] %s7103_s3 }
   0x5   :  { %7165 = sst [smem:[#allocation36_spill]] %s7104_s4 }
   0x6   :  { %7166 = sst [smem:[#allocation37_spill]] %s7105_s5 }
   0x7   :  { %7167 = sst [smem:[#allocation38_spill]] %s7107_s7 }
   0x8   :  { %7168 = sst [smem:[#allocation39_spill]] %s7108_s8 }
   0x9   :  { %7169 = sst [smem:[#allocation40_spill]] %s7109_s9 }
   0xa   :  { %7170 = sst [smem:[#allocation41_spill]] %s7112_s12 }
   0xb   :  { %7171 = sst [smem:[#allocation42_spill]] %s7113_s13 }
   0xc   :  { %7172 = sst [smem:[#allocation43_spill]] %s7114_s14 }
   0xd   :  { %7173 = sst [smem:[#allocation44_spill]] %s7115_s15 }
   0xe   :  { %7174 = sst [smem:[#allocation45_spill]] %s7116_s16 }
   0xf   :  { %7175 = sst [smem:[#allocation46_spill]] %s7117_s17 }
  0x10   :  { %7176 = sst [smem:[#allocation47_spill]] %s7120_s20 }
  0x11   :  { %25 = vsyncpa [#allocation3], 0 }
  0x12   :  { %27 = vsyncpa [#allocation3 + $0x1], 0 }
  0x13   :  { %28 = vsyncpa [#allocation7], 0 }
  0x14   :  { %30 = vsyncpa [#allocation7 + $0x1], 0 }
  0x15   :  { %31 = vsyncpa [#allocation10], 0 }
  0x16   :  { %32 = vsyncpa [#allocation13], 0 }
  0x17   :  { %33 = vsyncpa [#allocation5], 0 }
  0x18   :  { %34 = vsyncpa [#allocation16], 0 }
  0x19   :  { %35 = vsyncpa [#allocation4], 0 }
  0x1a   :  { %37 = vsyncpa [#allocation4 + $0x1], 0  ;;  %s5961_s1 = smov 0   ;;  %s5963_s22 = smov 0  }
  0x1b   :  { %s5965_s23 = smov 0   ;;  %s5967_s24 = smov 0  }
  0x1c LB: > { %7177 = sst [smem:[#allocation25_spill]] %s5809_s1  ;;  %s5982_s2 = sadd.s32 4294967295, %s5821_s24   ;;  %s5821_s24 = sphi %s5967_s24, %s7247_s24   ;;  %s5817_s23 = sphi %s5965_s23, %s7249_s23   ;;  %s5813_s22 = sphi %s5963_s22, %s7251_s22   ;;  %s5809_s1 = sphi %s5961_s1, %s7250_s1  }
  0x1d   : > { %7178 = sst [smem:[#allocation26_spill]] %s5817_s23  ;;  %s4972_s25 = sadd.s32 4294967294, %s5821_s24  }
  0x1e   : > { %7179 = sst [smem:[#allocation27_spill]] %s5821_s24  ;;  %p63_p0 = scmp.ne.s32.totalorder %s5813_s22, %s5809_s1 }
  0x1f   : > { %p7129_p1 = scmp.eq.s32.totalorder %s5982_s2, 0  ;;  %p517_p3 = scmp.eq.s32.totalorder %s4972_s25, 1 }
  0x20   : > { %p4973_p5 = scmp.ge.s32.totalorder %s5821_s24, 1  ;;  %p524_p7 = scmp.lt.s32.totalorder %s5821_s24, 3 }
  0x21   : > { %p5991_p4 = por %p7129_p1, %p63_p0  ;;  %p5996_p6 = por %p517_p3, %p63_p0 }
  0x22   : > { %p6001_p8 = pnand %p4973_p5, %p524_p7  ;;  %s5823_s28 = smov [#allocation9]  }
  0x23   : > { %s7180_s3 = scalar_select %p5991_p4, 1, 0 }
  0x24   : > { %s7181_s26 = scalar_select %p5996_p6, 1, 0 }
  0x25   : > { %s7183_s27 = scalar_select %p6001_p8, 1, 0 }
  0x26   : > { %7182 = sst [smem:[#allocation28_spill]] %s7181_s26  ;;  %s543_s4 = sshll.u32 %s5823_s28, 4  ;;  %s544_s4 = int_to_ptr.vmem [resolvable:$true] %s543_s4 }
  0x27   : > { %p5381_p10 = pneg %p6001_p8  ;;  %s6009_s29 = sadd.s32 1, %s5821_s24  }
  0x28   : > { %7184 = sst [smem:[#allocation29_spill]] %s6009_s29  ;;  %s47_s0 = ssub.s32 %s5821_s24, %s6009_s29 }
  0x29   : > { %p6013_p11 = pnand %p5381_p10, %p7129_p1  ;;  %p6019_p12 = scmp.eq.s32.totalorder %s47_s0, 0 }
  0x2a   : > { %s50_s25 = sadd.s32 1, %s5817_s23  ;;  %s7187_s8 = sld [smem:[#allocation39_spill]] }
  0x2b   : > { %s7185_s30 = scalar_select %p6013_p11, 1, 0 }
  0x2c   : > { %s7186_s21 = scalar_select %p6019_p12, 1, 0 }
  0x2d   : > { %p6034_p3 = pneg %p6013_p11 }
  0x2f   : > { %s7188_s13 = scalar_select %p6034_p3, 1, 0 }
  0x30   : > { %s5531_s1 = scalar_lea.hbm %s7187_s8, 16 }
  0x31   : > { %p5532_p0 = scmp.ne.s32.totalorder %s7187_s8, %s5531_s1  ;;  %p5538_p10 = scmp.lt.u32.totalorder %s5531_s1, %s7187_s8 }
  0x33   : > { %p5534_p5 = pnand %p6034_p3, %p5532_p0 }
  0x35   : > { %p5535_p7 = pneg %p5534_p5 }
  0x37   : > { %p5540_p9 = pnand %p5538_p10, %p5535_p7 }
  0x39   : > { %5543 = shalt.err (!%p5540_p9)
}
  0x3a   : > { %s5544_s26 = scalar_lea.vmem %s544_s4, 16  ;;  %s5551_s15 = scalar_lea.vmem %s544_s4, 32 }
  0x3b   : > { %p5545_p1 = scmp.ne.s32.totalorder %s544_s4, %s5544_s26  ;;  %p5552_p6 = scmp.lt.s32.totalorder %s544_s4, %s544_s4 }
  0x3c   : > { %p5553_p4 = scmp.lt.s32.totalorder %s5551_s15, %s5544_s26 }
  0x3d   : > { %p5547_p2 = pnand %p5545_p1, %p6034_p3 }
  0x3e   : > { %p5554_p8 = por %p5553_p4, %p5552_p6 }
  0x3f   : > { %p5548_p13 = pneg %p5547_p2 }
  0x41   : > { %p5555_p12 = pnand %p5554_p8, %p5548_p13 }
  0x43   : > { %5558 = shalt.err (!%p5555_p12)
}
  0x44   : > { %5384 = dma.hbm_to_vmem [thread:$0]  (!%p6013_p11), %s7187_s8, 16, %s544_s4, [#allocation10]  }
  0x45   : > { %p7189_p1 = scmp.ne.s32.totalorder %s7186_s21, 0  ;;  %p58_p2 = scmp.eq.s32.totalorder %s5821_s24, 0 }
  0x46   : > { %p7191_p4 = scmp.ne.s32.totalorder %s5817_s23, %s5813_s22  ;;  %p7192_p6 = scmp.eq.s32.totalorder %s5982_s2, 1 }
  0x47   : > { %s6053_s1 = scalar_select %p7189_p1, %s5817_s23, %s50_s25  }
  0x48   : > { %p6061_p8 = por %p7192_p6, %p7191_p4  ;;  %p5416_p9 = scmp.lt.s32.totalorder %s5821_s24, 2 }
  0x49   : > { %7190 = sst [smem:[#allocation30_spill]] %s6053_s1  ;;  %s6067_s0 = sand.u32 1, %s5817_s23  }
  0x4a   : > { %s7193_s29 = scalar_select %p6061_p8, 1, 0 }
  0x4b   : > { %p7195_p12 = pmov %p7191_p4  ;;  %s7138_s26 = sshll.u32 %s6067_s0, 3 }
  0x4c   : > { %7194 = sst [smem:[#allocation31_spill]] %s7193_s29  ;;  %s6074_s15 = sshll.u32 %s5821_s24, 4 }
  0x4d   : > { %p59_p13 = por %p58_p2, %p7195_p12  ;;  %s641_s21 = sand.u32 1, %s5821_s24  }
  0x4e   : > { %s7197_s28 = sld [smem:[#allocation33_spill]]  ;;  %s645_s1 = scalar_lea.vmem [#allocation6], %s7138_s26 }
  0x4f   : > { %p6076_p0 = pnand %p5416_p9, %p59_p13  ;;  %s651_s23 = sshll.u32 %s645_s1, 4  ;;  %s6089_s23 = int_to_ptr.vmem [resolvable:$true] %s651_s23 }
  0x50   : > { %s5824_s29 = smov [#allocation11]   ;;  %s6093_s12 = scalar_lea.sflag [#allocation7], %s641_s21 }
  0x51   : > { %s7196_s4 = scalar_select %p6076_p0, 1, 0 }
  0x52   : > { %s6091_s14 = sshll.u32 %s5824_s29, 4  ;;  %p6099_p7 = pneg %p6076_p0  ;;  %s557_s14 = int_to_ptr.vmem [resolvable:$true] %s6091_s14 }
  0x54   : > { %s6085_s8 = scalar_lea.hbm %s7197_s28, %s6074_s15  ;;  %s5564_s26 = scalar_lea.hbm %s7197_s28, 256 }
  0x55   : > { %s5559_s24 = scalar_lea.hbm %s6085_s8, 128  ;;  %p5565_p2 = scmp.lt.u32.totalorder %s6085_s8, %s7197_s28 }
  0x56   : > { %p5560_p5 = scmp.ne.s32.totalorder %s6085_s8, %s5559_s24  ;;  %p5566_p4 = scmp.lt.u32.totalorder %s5564_s26, %s5559_s24 }
  0x57   : > { %s7198_s25 = scalar_select %p6099_p7, 1, 0 }
  0x58   : > { %p5562_p10 = pnand %p6099_p7, %p5560_p5  ;;  %p5567_p6 = por %p5566_p4, %p5565_p2 }
  0x59   : > { %p5568_p9 = scmp.lt.u32.totalorder %s5559_s24, %s6085_s8 }
  0x5a   : > { %p5563_p1 = pneg %p5562_p10 }
  0x5b   : > { %p5569_p12 = por %p5568_p9, %p5567_p6 }
  0x5d   : > { %p5570_p13 = pnand %p5569_p12, %p5563_p1 }
  0x5f   : > { %5573 = shalt.err (!%p5570_p13)
}
  0x60   : > { %s5574_s21 = scalar_lea.vmem %s6089_s23, 128  ;;  %s5825_s20 = smov [#allocation6]  }
  0x61   : > { %p5575_p5 = scmp.ne.s32.totalorder %s6089_s23, %s5574_s21  ;;  %s5579_s1 = sshll.u32 %s5825_s20, 4  ;;  %s5580_s1 = int_to_ptr.vmem [resolvable:$false] %s5579_s1 }
  0x62   : > { %s5581_s5 = scalar_lea.vmem %s5580_s1, 256  ;;  %p5582_p11 = scmp.lt.s32.totalorder %s6089_s23, %s5580_s1 }
  0x63   : > { %p5577_p10 = pnand %p5575_p5, %p6099_p7  ;;  %p5583_p3 = scmp.lt.s32.totalorder %s5581_s5, %s5574_s21 }
  0x65   : > { %p5578_p8 = pneg %p5577_p10  ;;  %p5584_p2 = por %p5583_p3, %p5582_p11 }
  0x67   : > { %p5585_p4 = pnand %p5584_p2, %p5578_p8 }
  0x69   : > { %5588 = shalt.err (!%p5585_p4)
}
  0x6a   : > { %s7150_s24 = smov 32   ;;  %s7151_s26 = smov 16  }
  0x6b   : > { %s7152_s29 = smov 1   ;;  %s5589_s1 = scalar_lea.hbm %s7110_s10, 512 }
  0x6c   : > { %5403 = dma.hbm_to_vmem [thread:$0]  (!%p6076_p0), %s6085_s8, 128, %s6089_s23, %s6093_s12, %s7150_s24, %s7151_s26, %s7152_s29  }
  0x6d   : > { %p5590_p11 = scmp.ne.s32.totalorder %s7110_s10, %s5589_s1  ;;  %p7199_p3 = scmp.ne.s32.totalorder %s7188_s13, 0 }
  0x6e   : > { %p5596_p6 = scmp.lt.u32.totalorder %s5589_s1, %s7110_s10 }
  0x6f   : > { %p5592_p8 = pnand %p5590_p11, %p7199_p3 }
  0x71   : > { %p5593_p1 = pneg %p5592_p8 }
  0x73   : > { %p5598_p9 = pnand %p5596_p6, %p5593_p1 }
  0x75   : > { %5601 = shalt.err (!%p5598_p9)
}
  0x76   : > { %s5602_s9 = scalar_lea.vmem %s557_s14, 512  ;;  %p5610_p10 = scmp.lt.s32.totalorder %s557_s14, %s557_s14 }
  0x77   : > { %p5603_p12 = scmp.ne.s32.totalorder %s557_s14, %s5602_s9  ;;  %p5611_p2 = scmp.lt.s32.totalorder %s5602_s9, %s5602_s9 }
  0x79   : > { %p5605_p13 = pnand %p5603_p12, %p7199_p3  ;;  %p5612_p4 = por %p5611_p2, %p5610_p10 }
  0x7b   : > { %p5606_p5 = pneg %p5605_p13 }
  0x7d   : > { %p5613_p0 = pnand %p5612_p4, %p5606_p5 }
  0x7f   : > { %5616 = shalt.err (!%p5613_p0)
}
  0x80   : > { %s5829_s8 = smov 128   ;;  %s5830_s23 = smov 8  }
  0x81   : > { %p7200_p11 = scmp.ne.s32.totalorder %s7185_s30, 0  ;;  %s5831_s28 = smov [#allocation12]  }
  0x82   : > { %s570_s20 = sshll.u32 %s5831_s28, 4  ;;  %s599_s5 = sshll.u32 %s7118_s18, 4  ;;  %s571_s20 = int_to_ptr.vmem [resolvable:$true] %s570_s20  ;;  %s6148_s5 = int_to_ptr.vmem [resolvable:$true] %s599_s5 }
  0x83   : > { %5387 = dma.hbm_to_vmem [thread:$0]  (!%p7200_p11), %s7110_s10, 512, %s557_s14, [#allocation10], %s5829_s8, %s5829_s8, %s5830_s23  }
  0x84   : > { %s5617_s26 = scalar_lea.hbm %s7111_s11, 16 }
  0x85   : > { %p5618_p0 = scmp.ne.s32.totalorder %s7111_s11, %s5617_s26  ;;  %p5624_p6 = scmp.lt.u32.totalorder %s5617_s26, %s7111_s11 }
  0x87   : > { %p5620_p8 = pnand %p5618_p0, %p7199_p3 }
  0x89   : > { %p5621_p1 = pneg %p5620_p8 }
  0x8b   : > { %p5626_p9 = pnand %p5624_p6, %p5621_p1 }
  0x8d   : > { %5629 = shalt.err (!%p5626_p9)
}
  0x8e   : > { %s5630_s23 = scalar_lea.vmem %s571_s20, 16  ;;  %s5637_s24 = scalar_lea.vmem %s571_s20, 32 }
  0x8f   : > { %p5631_p12 = scmp.ne.s32.totalorder %s571_s20, %s5630_s23  ;;  %p5638_p10 = scmp.lt.s32.totalorder %s571_s20, %s571_s20 }
  0x90   : > { %p5639_p2 = scmp.lt.s32.totalorder %s5637_s24, %s5630_s23 }
  0x91   : > { %p5633_p13 = pnand %p5631_p12, %p7199_p3 }
  0x92   : > { %p5640_p4 = por %p5639_p2, %p5638_p10 }
  0x93   : > { %p5634_p5 = pneg %p5633_p13 }
  0x95   : > { %p5641_p7 = pnand %p5640_p4, %p5634_p5 }
  0x97   : > { %5644 = shalt.err (!%p5641_p7)
}
  0x98   : > { %5390 = dma.hbm_to_vmem [thread:$0]  (!%p7200_p11), %s7111_s11, 16, %s571_s20, [#allocation13]  }
  0x99   : > { %s610_s17 = sshll.u32 %s7119_s19, 4  ;;  %s5645_s28 = scalar_lea.vmem %s6148_s5, 16  ;;  %s611_s17 = int_to_ptr.vmem [resolvable:$true] %s610_s17 }
  0x9a   : > { %p5646_p0 = scmp.ne.s32.totalorder %s6148_s5, %s5645_s28  ;;  %p5653_p7 = scmp.lt.s32.totalorder %s6148_s5, %s6148_s5 }
  0x9b   : > { %p5654_p6 = scmp.lt.s32.totalorder %s5645_s28, %s5645_s28 }
  0x9c   : > { %p5648_p8 = pnand %p5646_p0, %p7199_p3 }
  0x9d   : > { %p5655_p9 = por %p5654_p6, %p5653_p7 }
  0x9e   : > { %p5649_p1 = pneg %p5648_p8 }
  0xa0   : > { %p5656_p12 = pnand %p5655_p9, %p5649_p1 }
  0xa2   : > { %5659 = shalt.err (!%p5656_p12)
}
  0xa3   : > { %s5832_s21 = smov [#allocation14]   ;;  %s5660_s20 = scalar_lea.vmem %s611_s17, 16 }
  0xa4   : > { %5393 = dma.vmem_to_smem (!%p7200_p11), %s6148_s5, 16, %s5832_s21, [#allocation5]  }
  0xa5   : > { %p5661_p13 = scmp.ne.s32.totalorder %s611_s17, %s5660_s20  ;;  %p5668_p2 = scmp.lt.s32.totalorder %s611_s17, %s611_s17 }
  0xa6   : > { %p5669_p4 = scmp.lt.s32.totalorder %s5660_s20, %s5660_s20 }
  0xa7   : > { %p5663_p5 = pnand %p5661_p13, %p7199_p3 }
  0xa8   : > { %p5670_p0 = por %p5669_p4, %p5668_p2 }
  0xa9   : > { %p5664_p10 = pneg %p5663_p5 }
  0xab   : > { %p5671_p8 = pnand %p5670_p0, %p5664_p10 }
  0xad   : > { %5674 = shalt.err (!%p5671_p8)
}
  0xae   : > { %s5833_s1 = smov [#allocation15]   ;;  %s7201_s14 = sld [smem:[#allocation32_spill]] }
  0xaf   : > { %5396 = dma.vmem_to_smem (!%p7200_p11), %s611_s17, 16, %s5833_s1, [#allocation16]  }
  0xb0   : > { %s7202_s13 = sshll.u32 %s6067_s0, 3  ;;  %s622_s30 = scalar_lea.sflag [#allocation3], %s6067_s0 }
  0xb1   : > { %s625_s23 = scalar_lea.vmem [#allocation2], %s7202_s13  ;;  %p7203_p1 = scmp.ne.s32.totalorder %s7198_s25, 0 }
  0xb2   : > { %s631_s24 = sshll.u32 %s625_s23, 4  ;;  %s6192_s24 = int_to_ptr.vmem [resolvable:$true] %s631_s24 }
  0xb4   : > { %s6188_s8 = scalar_lea.hbm %s7201_s14, %s6074_s15  ;;  %s5680_s16 = scalar_lea.hbm %s7201_s14, 256 }
  0xb5   : > { %s5675_s7 = scalar_lea.hbm %s6188_s8, 128  ;;  %p5681_p6 = scmp.lt.u32.totalorder %s6188_s8, %s7201_s14 }
  0xb6   : > { %p5676_p3 = scmp.ne.s32.totalorder %s6188_s8, %s5675_s7  ;;  %p5682_p9 = scmp.lt.u32.totalorder %s5680_s16, %s5675_s7 }
  0xb7   : > { %p5684_p13 = scmp.lt.u32.totalorder %s5675_s7, %s6188_s8 }
  0xb8   : > { %p5678_p7 = pnand %p5676_p3, %p7203_p1  ;;  %p5683_p12 = por %p5682_p9, %p5681_p6 }
  0xba   : > { %p5679_p11 = pneg %p5678_p7  ;;  %p5685_p5 = por %p5684_p13, %p5683_p12 }
  0xbc   : > { %p5686_p10 = pnand %p5685_p5, %p5679_p11 }
  0xbe   : > { %5689 = shalt.err (!%p5686_p10)
}
  0xbf   : > { %s5690_s21 = scalar_lea.vmem %s6192_s24, 128  ;;  %s5834_s20 = smov [#allocation2]  }
  0xc0   : > { %p5691_p2 = scmp.ne.s32.totalorder %s6192_s24, %s5690_s21  ;;  %s5695_s1 = sshll.u32 %s5834_s20, 4  ;;  %s5696_s1 = int_to_ptr.vmem [resolvable:$false] %s5695_s1 }
  0xc1   : > { %s5697_s5 = scalar_lea.vmem %s5696_s1, 256  ;;  %p5698_p8 = scmp.lt.s32.totalorder %s6192_s24, %s5696_s1 }
  0xc2   : > { %p5693_p4 = pnand %p5691_p2, %p7203_p1  ;;  %p5699_p3 = scmp.lt.s32.totalorder %s5697_s5, %s5690_s21 }
  0xc4   : > { %p5694_p0 = pneg %p5693_p4  ;;  %p5700_p7 = por %p5699_p3, %p5698_p8 }
  0xc6   : > { %p5701_p6 = pnand %p5700_p7, %p5694_p0 }
  0xc8   : > { %5704 = shalt.err (!%p5701_p6)
}
  0xc9   : > { %p7204_p11 = scmp.ne.s32.totalorder %s7196_s4, 0  ;;  %s7205_s9 = smov 1  }
  0xca   : > { %s7206_s13 = smov 16   ;;  %s7207_s23 = smov 32  }
  0xcb   : > { %5400 = dma.hbm_to_vmem [thread:$0]  (!%p7204_p11), %s6188_s8, 128, %s6192_s24, %s622_s30, %s7207_s23, %s7206_s13, %s7205_s9  }
  0xcc   : > { %s7208_s26 = sld [smem:[#allocation34_spill]]  ;;  %s664_s17 = scalar_lea.vmem [#allocation8], %s6067_s0 }
  0xcd   : > { %s671_s28 = sshll.u32 %s664_s17, 4  ;;  %s672_s28 = int_to_ptr.vmem [resolvable:$true] %s671_s28 }
  0xd2   : > { %s6225_s16 = scalar_lea.hbm %s7208_s26, %s6074_s15  ;;  %s5710_s8 = scalar_lea.hbm %s7208_s26, 32 }
  0xd3   : > { %s5705_s21 = scalar_lea.hbm %s6225_s16, 16  ;;  %p5711_p5 = scmp.lt.u32.totalorder %s6225_s16, %s7208_s26 }
  0xd4   : > { %p5706_p9 = scmp.ne.s32.totalorder %s6225_s16, %s5705_s21  ;;  %p5712_p10 = scmp.lt.u32.totalorder %s5710_s8, %s5705_s21 }
  0xd5   : > { %p5714_p4 = scmp.lt.u32.totalorder %s5705_s21, %s6225_s16 }
  0xd6   : > { %p5708_p12 = pnand %p5706_p9, %p7203_p1  ;;  %p5713_p2 = por %p5712_p10, %p5711_p5 }
  0xd8   : > { %p5709_p13 = pneg %p5708_p12  ;;  %p5715_p0 = por %p5714_p4, %p5713_p2 }
  0xda   : > { %p5716_p8 = pnand %p5715_p0, %p5709_p13 }
  0xdc   : > { %5719 = shalt.err (!%p5716_p8)
}
  0xdd   : > { %s5720_s0 = scalar_lea.vmem %s672_s28, 16  ;;  %s5835_s15 = smov [#allocation8]  }
  0xde   : > { %p5721_p3 = scmp.ne.s32.totalorder %s672_s28, %s5720_s0  ;;  %s5725_s5 = sshll.u32 %s5835_s15, 4  ;;  %s5726_s5 = int_to_ptr.vmem [resolvable:$false] %s5725_s5 }
  0xdf   : > { %s5727_s9 = scalar_lea.vmem %s5726_s5, 32  ;;  %p5728_p9 = scmp.lt.s32.totalorder %s672_s28, %s5726_s5 }
  0xe0   : > { %p5723_p7 = pnand %p5721_p3, %p7203_p1  ;;  %p5729_p12 = scmp.lt.s32.totalorder %s5727_s9, %s5720_s0 }
  0xe2   : > { %p5724_p6 = pneg %p5723_p7  ;;  %p5730_p11 = por %p5729_p12, %p5728_p9 }
  0xe4   : > { %p5731_p5 = pnand %p5730_p11, %p5724_p6 }
  0xe6   : > { %5734 = shalt.err (!%p5731_p5)
}
  0xe7   : > { %p7209_p10 = scmp.ne.s32.totalorder %s7196_s4, 0  ;;  %p7210_p13 = scmp.ne.s32.totalorder %s7183_s27, 0 }
  0xe8   : > { %s6249_s25 = sand.u32 (!%p7210_p13), 1, %s5813_s22   ;;  %p7211_p1 = scmp.ne.s32.totalorder (!%p7210_p13), %s7180_s3, 0 }
  0xe9   : > { %5406 = dma.hbm_to_vmem [thread:$0]  (!%p7209_p10), %s6225_s16, 16, %s672_s28, %s6093_s12  }
  0xea   : > { %701 = sbr.rel (%p7210_p13) target bundleno = 4346 (0x10fa), region = 100  ;;  %s6252_s13 = sshll.u32 (!%p7210_p13), %s6249_s25, 3 }
  0xeb   : > { %s704_s23 = scalar_lea.sflag (!%p7210_p13), [#allocation3], %s6249_s25  ;;  %s6256_s7 = scalar_lea.vmem (!%p7210_p13), [#allocation2], %s6252_s13 }
  0xf1   : > { %5780 = dma.done.wait (%p7211_p1), %s704_s23, 128  }
  0xf2   : > { %5782 = vsyncadd (%p7211_p1), %s704_s23, 4294967168  ;;  %s712_s12 = sand.u32 1, %s5982_s2   ;;  %s6264_s4 = scalar_lea.vmem [#allocation6], %s6252_s13 }
  0xf3   : > { %s713_s27 = scalar_lea.sflag [#allocation7], %s712_s12 }
  0xf4   : > { %5784 = dma.done.wait (%p7211_p1), %s713_s27, 144  }
  0xf5   : > { %5786 = vsyncadd (%p7211_p1), %s713_s27, 4294967152  ;;  %p7212_p11 = scmp.eq.s32.totalorder %s5982_s2, 0 }
  0xf7   : > { %5788 = dma.done.wait (%p7212_p11), [#allocation10], 528   ;;  %p7213_p2 = pmov %p7212_p11 }
  0xf9   : > { %5790 = vsyncadd (%p7213_p2), [#allocation10], 4294966768  ;;  %p7214_p4 = pmov %p7213_p2 }
  0xfa   : > { %p7215_p0 = pmov %p7213_p2 }
  0xfb   : > { %5792 = dma.done.wait (%p7214_p4), [#allocation13], 16  }
  0xfc   : > { %5794 = vsyncadd (%p7215_p0), [#allocation13], 4294967280  ;;  %p7216_p8 = pmov %p7215_p0 }
  0xfd   : > { %p7217_p3 = pmov %p7215_p0 }
  0xfe   : > { %5796 = dma.done.wait (%p7216_p8), [#allocation5], 16  }
  0xff   : > { %5798 = vsyncadd (%p7217_p3), [#allocation5], 4294967280  ;;  %p7218_p7 = pmov %p7215_p0 }
 0x100   : > { %p7219_p6 = pmov %p7215_p0 }
 0x101   : > { %5800 = dma.done.wait (%p7218_p7), [#allocation16], 16  }
 0x102   : > { %5802 = vsyncadd (%p7219_p6), [#allocation16], 4294967280 }
 0x103   : > { %749 = sfence }
 0x104   : > { %v851_v0 = vld [vmem:[%s7106_s6] sm:$0xff]  ;;  %v852_v1 = vld [vmem:[%s7106_s6 + $0x8] sm:$0xff]  ;;  %v853_v2 = vld [vmem:[%s7106_s6 + $0x10] sm:$0xff]  ;;  %v5836_v3 = vmov 0.0|0.0   ;;  %vm5837_vm0 = vmmov 0   ;;  %v5838_v6 = vmov 0.0   ;;  %v870_v7 = vlaneseq }
 0x105   : > { %5317 = vmatprep.subr.bf16.mxu0 %v5836_v3  ;;  %v5318_v4 = vpack.c.bf16 %v852_v1, %v851_v0  ;;  %v854_v5 = vld [vmem:[%s7106_s6 + $0x18] sm:$0xff]  ;;  %5145 = vmatprep.mubr.msk.f32.mxu0 %vm5837_vm0, %v5838_v6  ;;  %v6303_v8 = vld [vmem:[%s6256_s7] sm:$0x1]  ;;  %v6306_v9 = vld [vmem:[%s6256_s7 + $0x1] sm:$0x1]  ;;  %vm912_vm1 = vcmask 261120  }
 0x106   : > { %v6309_v10 = vld [vmem:[%s6256_s7 + $0x2] sm:$0x1]  ;;  %5153 = vmatprep.subr.mxu1 %v5838_v6  ;;  %5155 = vmatprep.mubr.msk.f32.mxu1 %vm5837_vm0, %v5838_v6  ;;  %v5321_v11 = vpack.c.bf16 %v854_v5, %v853_v2  ;;  %v6315_v12 = vld [vmem:[%s6256_s7 + $0x3] sm:$0x1]  ;;  %v6318_v13 = vld [vmem:[%s6256_s7 + $0x4] sm:$0x1]  ;;  %v863_v20 = vcombine.low %v6303_v8, %v6306_v9 }
 0x107   : > { %5319 = vmatpush3.bf16.msra.mxu0 %v5318_v4  ;;  %v6321_v14 = vld [vmem:[%s6256_s7 + $0x5] sm:$0x1]  ;;  %v6325_v15 = vld [vmem:[%s6256_s7 + $0x6] sm:$0x1]  ;;  %v6328_v16 = vld [vmem:[%s6256_s7 + $0x7] sm:$0x1]  ;;  %v864_v21 = vcombine.low %v6309_v10, %v6315_v12 }
 0x108   : > { %5320 = vmatprep.subr.bf16.mxu0 %v5836_v3  ;;  %v5839_v17 = vmov 1966171168   ;;  %v6330_v19 = vshrl.u32 %v870_v7, 7  ;;  %v865_v22 = vcombine.low %v6318_v13, %v6321_v14  ;;  %v866_v23 = vcombine.low %v6325_v15, %v6328_v16  ;;  %s5840_s24 = smov 96   ;;  %s5841_s30 = smov 88  }
 0x109   : > { %v868_v18 = vunpack.c.l.s4 %v5839_v17  ;;  %s5842_s0 = smov 80   ;;  %s5843_s15 = smov 120   ;;  %vm988_vm2 = vcmask 64512   ;;  %vm2521_vm3 = vcmask 523264   ;;  %vm4750_vm4 = vcmask 253952  }
 0x10a   : > { %s5844_s5 = smov 72   ;;  %s5845_s9 = smov 112  }
 0x10b   : > { %5322 = vmatpush3.bf16.msra.mxu0 %v5321_v11  ;;  %v869_v24 = vunpack.c.0.s8 %v868_v18  ;;  %s5846_s23 = smov 104   ;;  %s7159_s7 = smov 56  }
 0x10c   : > { %5148 = vmatprep.subr.mxu0 %v5838_v6  ;;  %s7158_s12 = smov 64   ;;  %s7156_s27 = smov 48  }
 0x10d   : > { %v6342_v25 = vsub.s32 %v869_v24, %v6330_v19  ;;  %s7157_s3 = smov 40   ;;  %s7220_s28 = sld [smem:[#allocation38_spill]] }
 0x10e   : > { %s7221_s1 = sld [smem:[#allocation40_spill]]  ;;  %s7223_s17 = sld [smem:[#allocation45_spill]] }
 0x10f   : > { %v873_v26 = vrot.slane %v863_v20, %v6342_v25  ;;  %v880_v27 = vrot.slane %v864_v21, %v6342_v25  ;;  %v887_v28 = vrot.slane %v865_v22, %v6342_v25  ;;  %v894_v29 = vrot.slane %v866_v23, %v6342_v25  ;;  %p823_p9 = scmp.lt.s32.totalorder %s5982_s2, 1  ;;  %s7232_s21 = smov 40  }
 0x110   : > { %s7233_s20 = smov 48  }
 0x111   : > { %v895_v30 = vcombine.low %v873_v26, %v880_v27  ;;  %v896_v31 = vcombine.low %v887_v28, %v894_v29 }
 0x113   : > { %v903_v32 = vrot.slane %v895_v30, %v6342_v25  ;;  %v910_v33 = vrot.slane %v896_v31, %v6342_v25 }
 0x114   : > { %s7222_s8 = smov %s7221_s1 }
 0x115   : > { %v911_v34 = vcombine.low %v903_v32, %v910_v33  ;;  %v1494_v32 = vld [vmem:[%s7220_s28 + $0x8] sm:$0xff]  ;;  %v1417_v33 = vld [vmem:[%s7220_s28] sm:$0xff] }
 0x117   : > { %5146 = vmatmul.mubr.msk.f32.vlgmr.msra.gmra.mrb[0].mxu0 %vm912_vm1, %v911_v34 }
 0x118   : > { %5150 = vmatprep.mubr.msk.f32.mxu0 %vm5837_vm0, %v5838_v6 }
 0x1ea   : > { %v6353_v35 = vpop.f32.mrb[0].mxu0 }
 0x1eb   : > { %986 = vrot.lane.b32.xlu1 %v6353_v35, %s5840_s24  ;;  %1065 = vrot.lane.b32.xlu0 %v6353_v35, %s5841_s30  ;;  %v5147_v36 = vpop.f32.mrb[1].mxu0 }
 0x1ef   : > { %1143 = vrot.lane.b32.xlu1 %v6353_v35, %s5842_s0  ;;  %1063 = vrot.lane.b32.xlu0 %v6353_v35, %s5843_s15 }
 0x1f3   : > { %1221 = vrot.lane.b32.xlu1 %v6353_v35, %s5844_s5  ;;  %1141 = vrot.lane.b32.xlu0 %v6353_v35, %s5845_s9 }
 0x1f7   : > { %1219 = vrot.lane.b32.xlu0 %v6353_v35, %s5846_s23 }
 0x25d   : > { %v987_v37 = vpop.permute.xlu1 %986  ;;  %v1066_v38 = vpop.permute.xlu0 %1065 }
 0x25e   : > { %5149 = vmatpush3.xpose.msk.msra.mxu0 %vm988_vm2, %v987_v37  ;;  %5154 = vmatpush3.xpose.msk.msra.mxu1 %vm988_vm2, %v1066_v38 }
 0x25f   : > { %5158 = vmatprep.subr.mxu0 %v5838_v6  ;;  %5163 = vmatprep.subr.mxu1 %v5838_v6 }
 0x261   : > { %5151 = vmatmul.mubr.msk.f32.vlgmr.msra.gmra.mrb[2].mxu0 %vm988_vm2, %v6353_v35  ;;  %v1144_v39 = vpop.permute.xlu1 %1143  ;;  %v1064_v40 = vpop.permute.xlu0 %1063 }
 0x262   : > { %5156 = vmatmul.mubr.msk.f32.vlgmr.msra.gmra.mrb[0].mxu1 %vm988_vm2, %v1064_v40  ;;  %5159 = vmatpush3.xpose.msk.msra.mxu0 %vm988_vm2, %v1144_v39 }
 0x263   : > { %5160 = vmatprep.mubr.msk.f32.mxu0 %vm5837_vm0, %v5838_v6  ;;  %5165 = vmatprep.mubr.msk.f32.mxu1 %vm5837_vm0, %v5838_v6 }
 0x264   : > { %5168 = vmatprep.subr.mxu0 %v5838_v6 }
 0x265   : > { %v1222_v41 = vpop.permute.xlu1 %1221  ;;  %v1142_v42 = vpop.permute.xlu0 %1141 }
 0x266   : > { %5161 = vmatmul.mubr.msk.f32.vlgmr.msra.gmra.mrb[4].mxu0 %vm988_vm2, %v1142_v42  ;;  %5164 = vmatpush3.xpose.msk.msra.mxu1 %vm988_vm2, %v1222_v41 }
 0x267   : > { %5173 = vmatprep.subr.mxu1 %v5838_v6  ;;  %5170 = vmatprep.mubr.msk.f32.mxu0 %vm5837_vm0, %v5838_v6 }
 0x269   : > { %v1220_v43 = vpop.permute.xlu0 %1219 }
 0x26a   : > { %5166 = vmatmul.mubr.msk.f32.vlgmr.msra.gmra.mrb[2].mxu1 %vm988_vm2, %v1220_v43 }
 0x26b   : > { %5175 = vmatprep.mubr.msk.f32.mxu1 %vm5837_vm0, %v5838_v6 }
 0x334   : > { %v1059_v44 = vpop.f32.mrb[2].mxu0 }
 0x335   : > { %v5152_v45 = vpop.f32.mrb[3].mxu0  ;;  %v1137_v46 = vpop.f32.mrb[0].mxu1  ;;  %v1297_v51 = vsel %vm988_vm2, %v1059_v44, -inf }
 0x336   : > { %v5157_v47 = vpop.f32.mrb[1].mxu1  ;;  %v1300_v48 = vsel %vm988_vm2, %v1137_v46, -inf }
 0x337   : > { %1301 = vmax.xlane.f32.xlu1 %v1300_v48 }
 0x339   : > { %v1215_v49 = vpop.f32.mrb[4].mxu0 }
 0x33a   : > { %v5162_v50 = vpop.f32.mrb[5].mxu0  ;;  %v1303_v54 = vsel %vm988_vm2, %v1215_v49, -inf }
 0x33b   : > { %1298 = vmax.xlane.f32.xlu1 %v1297_v51 }
 0x33d   : > { %v1293_v52 = vpop.f32.mrb[2].mxu1 }
 0x33e   : > { %v5167_v53 = vpop.f32.mrb[3].mxu1  ;;  %v1306_v55 = vsel %vm988_vm2, %v1293_v52, -inf }
 0x33f   : > { %1304 = vmax.xlane.f32.xlu1 %v1303_v54 }
 0x343   : > { %1307 = vmax.xlane.f32.xlu1 %v1306_v55 }
 0x3c4   : > { %v1302_v56 = vpop.xlane.xlu1 %1301 }
 0x3c5   : > { %v1310_v57 = vsub.f32 %v1137_v46, %v1302_v56  ;;  %v1717_v46 = vld [vmem:[%s7220_s28 + $0x10] sm:$0xff] }
 0x3c7   : > { %v1315_v58 = vmul.f32 1.442695, %v1310_v57 }
 0x3c8   : > { %v1299_v59 = vpop.xlane.xlu1 %1298 }
 0x3c9   : > { %5485 = vpow2.f32 %v1315_v58  ;;  %v1309_v60 = vsub.f32 %v1059_v44, %v1299_v59 }
 0x3cb   : > { %v1313_v61 = vmul.f32 1.442695, %v1309_v60 }
 0x3cc   : > { %v1305_v62 = vpop.xlane.xlu1 %1304 }
 0x3cd   : > { %5487 = vpow2.f32 %v1313_v61  ;;  %v1311_v63 = vsub.f32 %v1215_v49, %v1305_v62  ;;  %v1868_v49 = vld [vmem:[%s7220_s28 + $0x18] sm:$0xff]  ;;  %v5014_v61 = vld [vmem:[#allocation9] ss:$0 sm:$0xff] }
 0x3cf   : > { %v1317_v0 = vmul.f32 1.442695, %v1311_v63 }
 0x3d0   : > { %v1308_v1 = vpop.xlane.xlu1 %1307 }
 0x3d1   : > { %5489 = vpow2.f32 %v1317_v0  ;;  %v1312_v2 = vsub.f32 %v1293_v52, %v1308_v1 }
 0x3d3   : > { %v5486_v4 = vpop.eup %5485  ;;  %v1319_v5 = vmul.f32 1.442695, %v1312_v2 }
 0x3d4   : > { %v1324_v7 = vsel %vm988_vm2, %v5486_v4, 0.0 }
 0x3d5   : > { %5491 = vpow2.f32 %v1319_v5  ;;  %1325 = vadd.xlane.f32.xlu0 %v1324_v7 }
 0x3d7   : > { %v5488_v11 = vpop.eup %5487 }
 0x3d8   : > { %v1321_v17 = vsel %vm988_vm2, %v5488_v11, 0.0 }
 0x3d9   : > { %1322 = vadd.xlane.f32.xlu1 %v1321_v17 }
 0x3db   : > { %v5490_v18 = vpop.eup %5489 }
 0x3dc   : > { %v1327_v20 = vsel %vm988_vm2, %v5490_v18, 0.0 }
 0x3dd   : > { %1328 = vadd.xlane.f32.xlu1 %v1327_v20 }
 0x3df   : > { %v5492_v21 = vpop.eup %5491 }
 0x3e0   : > { %v1330_v22 = vsel %vm988_vm2, %v5492_v21, 0.0 }
 0x3e1   : > { %1331 = vadd.xlane.f32.xlu1 %v1330_v22 }
 0x3eb   : > { %1418 = vrot.lane.b32.xlu0 %v6353_v35, %s7159_s7  ;;  %s3591_s7 = sld [smem:[#allocation14]] }
 0x3ef   : > { %1341 = vrot.lane.b32.xlu0 %v6353_v35, %s7158_s12  ;;  %s5039_s12 = sld [smem:[#allocation14 + $0x1]] }
 0x3f2   : > { %1641 = vrot.lane.b32.xlu1 %v6353_v35, %s7156_s27  ;;  %s824_s27 = scalar_select %p823_p9, %s5982_s2, 1 }
 0x3f3   : > { %1792 = vrot.lane.b32.xlu0 %v6353_v35, %s7157_s3 }
 0x3f4   : > { %s6665_s3 = sshll.u32 %s824_s27, 3 }
 0x462   : > { %v1326_v23 = vpop.xlane.xlu0 %1325 }
 0x463   : > { %5493 = vrcp.f32 %v1326_v23 }
 0x466   : > { %v1419_v24 = vpop.permute.xlu0 %1418  ;;  %v1323_v26 = vpop.xlane.xlu1 %1322 }
 0x467   : > { %5495 = vrcp.f32 %v1323_v26  ;;  %5174 = vmatpush3.msra.mxu1 %v1419_v24 }
 0x468   : > { %5183 = vmatprep.subr.mxu1 %v5838_v6 }
 0x46a   : > { %v1342_v27 = vpop.permute.xlu0 %1341  ;;  %v1329_v34 = vpop.xlane.xlu1 %1328 }
 0x46b   : > { %5169 = vmatpush3.msra.mxu0 %v1342_v27  ;;  %5497 = vrcp.f32 %v1329_v34 }
 0x46c   : > { %5178 = vmatprep.subr.mxu0 %v5838_v6 }
 0x46d   : > { %v5494_v28 = vpop.eup %5493 }
 0x46e   : > { %v1336_v29 = vmul.f32 %v5494_v28, %v5486_v4  ;;  %v1332_v35 = vpop.xlane.xlu1 %1331  ;;  %v1793_v43 = vpop.permute.xlu0 %1792 }
 0x46f   : > { %5499 = vrcp.f32 %v1332_v35 }
 0x470   : > { %5176 = vmatmul.mubr.msk.f32.vlgmr.msra.gmra.mrb[4].mxu1 %vm988_vm2, %v1336_v29 }
 0x471   : > { %v5496_v30 = vpop.eup %5495  ;;  %5185 = vmatprep.mubr.msk.f32.mxu1 %vm5837_vm0, %v5838_v6  ;;  %5184 = vmatpush3.msra.mxu1 %v1417_v33 }
 0x472   : > { %v1334_v31 = vmul.f32 %v5496_v30, %v5488_v11  ;;  %5193 = vmatprep.subr.mxu1 %v5838_v6  ;;  %v1642_v38 = vpop.permute.xlu1 %1641 }
 0x474   : > { %5171 = vmatmul.mubr.msk.f32.vlgmr.msra.gmra.mrb[6].mxu0 %vm988_vm2, %v1334_v31 }
 0x475   : > { %5179 = vmatpush3.msra.mxu0 %v1494_v32  ;;  %5180 = vmatprep.mubr.msk.f32.mxu0 %vm5837_vm0, %v5838_v6  ;;  %v5498_v36 = vpop.eup %5497 }
 0x476   : > { %5188 = vmatprep.subr.mxu0 %v5838_v6  ;;  %v1338_v40 = vmul.f32 %v5498_v36, %v5490_v18 }
 0x479   : > { %v5500_v41 = vpop.eup %5499 }
 0x47a   : > { %v1340_v45 = vmul.f32 %v5500_v41, %v5492_v21 }
 0x543   : > { %v1490_v37 = vpop.f32.mrb[4].mxu1 }
 0x544   : > { %v5177_v39 = vpop.f32.mrb[5].mxu1  ;;  %5181 = vmatmul.mubr.msk.f32.vlgmr.msra.gmra.mrb[8].mxu0 %vm988_vm2, %v1490_v37 }
 0x545   : > { %5189 = vmatpush3.msra.mxu0 %v1642_v38  ;;  %5190 = vmatprep.mubr.msk.f32.mxu0 %vm5837_vm0, %v5838_v6 }
 0x546   : > { %5198 = vmatprep.subr.mxu0 %v5838_v6 }
 0x547   : > { %v1413_v42 = vpop.f32.mrb[6].mxu0 }
 0x548   : > { %v5172_v44 = vpop.f32.mrb[7].mxu0  ;;  %5186 = vmatmul.mubr.msk.f32.vlgmr.msra.gmra.mrb[6].mxu1 %vm988_vm2, %v1413_v42  ;;  %5191 = vmatmul.mubr.msk.f32.vlgmr.msra.gmra.mrb[10].mxu0 %vm988_vm2, %v1338_v40 }
 0x549   : > { %5199 = vmatpush3.msra.mxu0 %v1793_v43  ;;  %5200 = vmatprep.mubr.msk.f32.mxu0 %vm5837_vm0, %v5838_v6 }
 0x54a   : > { %5195 = vmatprep.mubr.msk.f32.mxu1 %vm5837_vm0, %v5838_v6  ;;  %5323 = vmatprep.subr.bf16.mxu0 %v5836_v3 }
 0x54b   : > { %5194 = vmatpush3.msra.mxu1 %v1717_v46 }
 0x54c   : > { %5201 = vmatmul.mubr.msk.f32.vlgmr.msra.gmra.mrb[12].mxu0 %vm988_vm2, %v1340_v45  ;;  %5203 = vmatprep.subr.mxu1 %v5838_v6 }
 0x54d   : > { %5224 = vmatprep.mubr.msk.f32.mxu0 %vm5837_vm0, %v5838_v6 }
 0x617   : > { %v1564_v47 = vpop.f32.mrb[8].mxu0 }
 0x618   : > { %v5182_v48 = vpop.f32.mrb[9].mxu0 }
 0x61b   : > { %v1637_v50 = vpop.f32.mrb[6].mxu1  ;;  %v1713_v51 = vpop.f32.mrb[10].mxu0 }
 0x61c   : > { %v1638_v52 = vadd.f32 %v1637_v50, %v1564_v47  ;;  %v5187_v53 = vpop.f32.mrb[7].mxu1  ;;  %v5192_v54 = vpop.f32.mrb[11].mxu0  ;;  %5196 = vmatmul.mubr.msk.f32.vlgmr.msra.gmra.mrb[8].mxu1 %vm988_vm2, %v1713_v51 }
 0x61d   : > { %5204 = vmatpush3.msra.mxu1 %v1868_v49  ;;  %5205 = vmatprep.mubr.msk.f32.mxu1 %vm5837_vm0, %v5838_v6 }
 0x61e   : > { %5227 = vmatprep.subr.mxu1 %v5838_v6 }
 0x61f   : > { %v1864_v55 = vpop.f32.mrb[12].mxu0 }
 0x620   : > { %v5202_v56 = vpop.f32.mrb[13].mxu0  ;;  %5206 = vmatmul.mubr.msk.f32.vlgmr.msra.gmra.mrb[10].mxu1 %vm988_vm2, %v1864_v55 }
 0x621   : > { %5229 = vmatprep.mubr.msk.f32.mxu1 %vm5837_vm0, %v5838_v6 }
 0x6ef   : > { %v1787_v57 = vpop.f32.mrb[8].mxu1 }
 0x6f0   : > { %v1791_v58 = vadd.f32 %v1787_v57, %v1638_v52  ;;  %v5197_v59 = vpop.f32.mrb[9].mxu1 }
 0x6f1   : > { %v843_v59 = vld [vmem:[%s6264_s4] sm:$0x1] }
 0x6f3   : > { %v1938_v60 = vpop.f32.mrb[10].mxu1 }
 0x6f4   : > { %v1942_v62 = vadd.f32 %v1938_v60, %v1791_v58  ;;  %v5207_v63 = vpop.f32.mrb[11].mxu1  ;;  %v844_v60 = vld [vmem:[%s6264_s4 + $0x1] sm:$0x1] }
 0x6f5   : > { %v847_v63 = vld [vmem:[%s6264_s4 + $0x4] sm:$0x1] }
 0x6f6   : > { %v1950_v0 = vadd.f32 %v5014_v61, %v1942_v62  ;;  %v845_v61 = vld [vmem:[%s6264_s4 + $0x2] sm:$0x1]  ;;  %v846_v62 = vld [vmem:[%s6264_s4 + $0x3] sm:$0x1] }
 0x6f8   : > { %v1952_v1 = vcombine.high %v1950_v0, %v1950_v0  ;;  %v1959_v2 = vrot.slane %v1950_v0, %v6342_v25  ;;  %v848_v0 = vld [vmem:[%s6264_s4 + $0x5] sm:$0x1] }
 0x6fa   : > { %v1966_v4 = vrot.slane %v1952_v1, %v6342_v25  ;;  %v1967_v5 = vcombine.high %v1959_v2, %v1959_v2  ;;  %v1975_v7 = vrot.slane %v1959_v2, %v6342_v25 }
 0x6fc   : > { %v1968_v11 = vcombine.high %v1966_v4, %v1966_v4  ;;  %v1982_v17 = vrot.slane %v1966_v4, %v6342_v25  ;;  %v1989_v18 = vrot.slane %v1967_v5, %v6342_v25  ;;  %v1997_v20 = vcombine.high %v1975_v7, %v1975_v7  ;;  %v849_v4 = vld [vmem:[%s6264_s4 + $0x6] sm:$0x1]  ;;  %v850_v5 = vld [vmem:[%s6264_s4 + $0x7] sm:$0x1]  ;;  %s7160_s4 = smov 32  }
 0x6fd   : > { %v6456_v21 = vadd.f32 %v1975_v7, %v6303_v8 }
 0x6fe   : > { %v1996_v22 = vrot.slane %v1968_v11, %v6342_v25  ;;  %v1998_v23 = vcombine.high %v1982_v17, %v1982_v17  ;;  %v1999_v24 = vcombine.high %v1989_v18, %v1989_v18  ;;  %v6460_v26 = vadd.f32 %v1989_v18, %v6306_v9 }
 0x6ff   : > { %v6463_v27 = vadd.f32 %v1997_v20, %v6309_v10  ;;  %v6466_v28 = vadd.f32 %v1982_v17, %v6318_v13  ;;  %v2080_v10 = vmul.f32 %v6456_v21, %v6456_v21  ;;  %v2460_v11 = vcombine.low %v843_v59, %v844_v60 }
 0x700   : > { %v2000_v29 = vcombine.high %v1996_v22, %v1996_v22  ;;  %v6469_v30 = vadd.f32 %v1999_v24, %v6315_v12  ;;  %v6472_v8 = vadd.f32 %v1996_v22, %v6321_v14  ;;  %v6475_v31 = vadd.f32 %v1998_v23, %v6325_v15 }
 0x701   : > { %v2025_v9 = vcombine.low %v6456_v21, %v6460_v26  ;;  %v2081_v13 = vmul.f32 %v6460_v26, %v6460_v26  ;;  %v2082_v32 = vmul.f32 %v6463_v27, %v6463_v27  ;;  %v2084_v35 = vmul.f32 %v6466_v28, %v6466_v28 }
 0x702   : > { %v6486_v12 = vadd.f32 %v2000_v29, %v6328_v16  ;;  %v2026_v14 = vcombine.low %v6463_v27, %v6469_v30  ;;  %v2027_v15 = vcombine.low %v6466_v28, %v6472_v8  ;;  %v2083_v33 = vmul.f32 %v6469_v30, %v6469_v30 }
 0x703   : > { %v2035_v34 = vrot.slane %v2025_v9, %v6342_v25  ;;  %v2085_v36 = vmul.f32 %v6472_v8, %v6472_v8  ;;  %v2096_v37 = vcombine.low %v2080_v10, %v2081_v13  ;;  %v2086_v39 = vmul.f32 %v6475_v31, %v6475_v31 }
 0x704   : > { %v2028_v16 = vcombine.low %v6475_v31, %v6486_v12  ;;  %v2042_v38 = vrot.slane %v2026_v14, %v6342_v25  ;;  %v2087_v40 = vmul.f32 %v6486_v12, %v6486_v12  ;;  %v2097_v41 = vcombine.low %v2082_v32, %v2083_v33  ;;  %v2514_v33 = vld [vmem:[%s7222_s8 + $0x8] sm:$0xff] }
 0x705   : > { %v2098_v42 = vcombine.low %v2084_v35, %v2085_v36  ;;  %v2049_v43 = vrot.slane %v2027_v15, %v6342_v25  ;;  %v2106_v47 = vrot.slane %v2096_v37, %v6342_v25  ;;  %v2461_v17 = vcombine.low %v845_v61, %v846_v62  ;;  %v2513_v15 = vld [vmem:[%s7221_s1] sm:$0xff]  ;;  %v2516_v36 = vld [vmem:[%s7222_s8 + $0x18] sm:$0xff]  ;;  %s7224_s1 = sld [smem:[#allocation46_spill]] }
 0x706   : > { %v2056_v44 = vrot.slane %v2028_v16, %v6342_v25  ;;  %v2057_v45 = vcombine.low %v2035_v34, %v2042_v38  ;;  %v2099_v46 = vcombine.low %v2086_v39, %v2087_v40  ;;  %v2113_v48 = vrot.slane %v2097_v41, %v6342_v25  ;;  %v2515_v34 = vld [vmem:[%s7222_s8 + $0x10] sm:$0xff]  ;;  %v2517_v16 = vld [vmem:[%s7222_s8 + $0x20] sm:$0xff]  ;;  %v2518_v38 = vld [vmem:[%s7222_s8 + $0x28] sm:$0xff] }
 0x707   : > { %v2120_v50 = vrot.slane %v2098_v42, %v6342_v25  ;;  %v2462_v18 = vcombine.low %v847_v63, %v848_v0  ;;  %v2463_v20 = vcombine.low %v849_v4, %v850_v5  ;;  %v2470_v22 = vrot.slane %v2460_v11, %v6342_v25  ;;  %v2519_v40 = vld [vmem:[%s7222_s8 + $0x30] sm:$0xff]  ;;  %v2520_v41 = vld [vmem:[%s7222_s8 + $0x38] sm:$0xff] }
 0x708   : > { %v2058_v49 = vcombine.low %v2049_v43, %v2056_v44  ;;  %v2127_v51 = vrot.slane %v2099_v46, %v6342_v25  ;;  %v2128_v52 = vcombine.low %v2106_v47, %v2113_v48  ;;  %v2065_v53 = vrot.slane %v2057_v45, %v6342_v25  ;;  %v5015_v43 = vld [vmem:[%s7223_s17] ss:$0 sm:$0xff] }
 0x709   : > { %v2477_v23 = vrot.slane %v2461_v17, %v6342_v25  ;;  %v2484_v24 = vrot.slane %v2462_v18, %v6342_v25  ;;  %v2491_v29 = vrot.slane %v2463_v20, %v6342_v25  ;;  %v5324_v35 = vpack.c.bf16 %v2514_v33, %v2513_v15 }
 0x70a   : > { %v2072_v54 = vrot.slane %v2058_v49, %v6342_v25  ;;  %v2129_v55 = vcombine.low %v2120_v50, %v2127_v51  ;;  %v2136_v57 = vrot.slane %v2128_v52, %v6342_v25  ;;  %v5327_v37 = vpack.c.bf16 %v2516_v36, %v2515_v34 }
 0x70b   : > { %v2492_v9 = vcombine.low %v2470_v22, %v2477_v23  ;;  %v2493_v10 = vcombine.low %v2484_v24, %v2491_v29  ;;  %5325 = vmatpush3.bf16.msra.mxu0 %v5324_v35  ;;  %v5330_v39 = vpack.c.bf16 %v2518_v38, %v2517_v16  ;;  %v5333_v42 = vpack.c.bf16 %v2520_v41, %v2519_v40  ;;  %s7225_s29 = smov %s7224_s1  ;;  %v5016_v44 = vld [vmem:[%s7224_s1] ss:$0 sm:$0xff]  ;;  %s7228_s1 = sld [smem:[#allocation36_spill]] }
 0x70c   : > { %v2073_v56 = vcombine.low %v2065_v53, %v2072_v54  ;;  %v2143_v58 = vrot.slane %v2129_v55, %v6342_v25  ;;  %5326 = vmatprep.subr.bf16.mxu0 %v5836_v3  ;;  %v2258_v46 = vcombine.high %v5015_v43, %v5015_v43  ;;  %v2329_v48 = vcombine.high %v5016_v44, %v5016_v44 }
 0x70d   : > { %v2500_v13 = vrot.slane %v2492_v9, %v6342_v25  ;;  %v2507_v32 = vrot.slane %v2493_v10, %v6342_v25  ;;  %v2265_v52 = vrot.slane %v5015_v43, %v6342_v25  ;;  %v2336_v55 = vrot.slane %v5016_v44, %v6342_v25 }
 0x70e   : > { %v2075_v1 = vsel %vm912_vm1, %v2073_v56, 0.0  ;;  %v2144_v2 = vcombine.low %v2136_v57, %v2143_v58  ;;  %v2272_v53 = vrot.slane %v2258_v46, %v6342_v25  ;;  %v2343_v56 = vrot.slane %v2329_v48, %v6342_v25 }
 0x70f   : > { %2076 = vadd.xlane.f32.xlu0 %v2075_v1  ;;  %v2508_v14 = vcombine.low %v2500_v13, %v2507_v32  ;;  %5328 = vmatpush3.bf16.msra.mxu0 %v5327_v37  ;;  %v2273_v58 = vcombine.high %v2265_v52, %v2265_v52  ;;  %v2344_v60 = vcombine.high %v2336_v55, %v2336_v55  ;;  %v6572_v62 = vsub.s32 0, %v6330_v19 }
 0x710   : > { %v2146_v7 = vsel %vm912_vm1, %v2144_v2, 0.0  ;;  %5329 = vmatprep.subr.bf16.mxu0 %v5836_v3  ;;  %v2274_v59 = vcombine.high %v2272_v53, %v2272_v53  ;;  %v2345_v61 = vcombine.high %v2343_v56, %v2343_v56  ;;  %v6575_v63 = vsub.s32 1, %v6330_v19 }
 0x711   : > { %2147 = vadd.xlane.f32.xlu1 %v2146_v7  ;;  %v6578_v0 = vsub.s32 2, %v6330_v19  ;;  %v6581_v1 = vsub.s32 3, %v6330_v19  ;;  %v6584_v2 = vsub.s32 4, %v6330_v19  ;;  %v6587_v4 = vsub.s32 5, %v6330_v19  ;;  %s830_s27 = scalar_lea.vmem %s7228_s1, %s6665_s3 }
 0x712   : > { %v6590_v5 = vsub.s32 6, %v6330_v19  ;;  %v6593_v7 = vsub.s32 7, %v6330_v19  ;;  %v2281_v11 = vrot.slane %v2265_v52, %v6342_v25  ;;  %v2288_v17 = vrot.slane %v2272_v53, %v6342_v25 }
 0x713   : > { %5331 = vmatpush3.bf16.msra.mxu0 %v5330_v39  ;;  %v2295_v18 = vrot.slane %v2273_v58, %v6342_v25  ;;  %v2302_v20 = vrot.slane %v2274_v59, %v6342_v25  ;;  %v2352_v22 = vrot.slane %v2336_v55, %v6342_v25  ;;  %v2359_v23 = vrot.slane %v2343_v56, %v6342_v25 }
 0x714   : > { %5332 = vmatprep.subr.bf16.mxu0 %v5836_v3  ;;  %v2366_v24 = vrot.slane %v2344_v60, %v6342_v25  ;;  %v2373_v29 = vrot.slane %v2345_v61, %v6342_v25  ;;  %v2303_v34 = vcombine.high %v2281_v11, %v2281_v11  ;;  %v2304_v35 = vcombine.high %v2288_v17, %v2288_v17 }
 0x715   : > { %v2305_v36 = vcombine.high %v2295_v18, %v2295_v18  ;;  %v2306_v37 = vcombine.high %v2302_v20, %v2302_v20  ;;  %v2374_v16 = vcombine.high %v2352_v22, %v2352_v22  ;;  %v2375_v38 = vcombine.high %v2359_v23, %v2359_v23 }
 0x716   : > { %v2376_v39 = vcombine.high %v2366_v24, %v2366_v24  ;;  %v2377_v40 = vcombine.high %v2373_v29, %v2373_v29 }
 0x717   : > { %5334 = vmatpush3.bf16.msra.mxu0 %v5333_v42 }
 0x718   : > { %5247 = vmatprep.subr.mxu0 %v5838_v6 }
 0x725   : > { %2509 = vrot.lane.b32.xlu0 %v2508_v14, %s7160_s4  ;;  %s7226_s4 = sld [smem:[#allocation35_spill]] }
 0x72b   : > { %s826_s16 = scalar_lea.vmem %s7226_s4, %s6665_s3 }
 0x79c   : > { %v2077_v45 = vpop.xlane.xlu0 %2076 }
 0x79d   : > { %v2079_v47 = vmul.f32 0.03125, %v2077_v45 }
 0x79e   : > { %v2148_v49 = vpop.xlane.xlu1 %2147 }
 0x79f   : > { %v2149_v50 = vmul.f32 0.03125, %v2148_v49  ;;  %v2150_v51 = vmul.f32 %v2079_v47, %v2079_v47  ;;  %v2156_v9 = vrot.slane %v2079_v47, %v6572_v62  ;;  %v2160_v19 = vrot.slane %v2079_v47, %v6575_v63 }
 0x7a0   : > { %v2164_v10 = vrot.slane %v2079_v47, %v6578_v0  ;;  %v2168_v13 = vrot.slane %v2079_v47, %v6581_v1  ;;  %v2172_v32 = vrot.slane %v2079_v47, %v6584_v2  ;;  %v2176_v14 = vrot.slane %v2079_v47, %v6587_v4 }
 0x7a1   : > { %v2151_v54 = vsub.f32 %v2149_v50, %v2150_v51  ;;  %v2180_v15 = vrot.slane %v2079_v47, %v6590_v5  ;;  %v2184_v33 = vrot.slane %v2079_v47, %v6593_v7  ;;  %v2193_v41 = vsub.f32 %v6456_v21, %v2156_v9 }
 0x7a2   : > { %v2194_v42 = vsub.f32 %v6460_v26, %v2160_v19  ;;  %v2195_v43 = vsub.f32 %v6463_v27, %v2164_v10  ;;  %v2196_v44 = vsub.f32 %v6469_v30, %v2168_v13  ;;  %v2197_v46 = vsub.f32 %v6466_v28, %v2172_v32 }
 0x7a3   : > { %v2201_v57 = vadd.f32 1e-05, %v2151_v54  ;;  %v2198_v47 = vsub.f32 %v6472_v8, %v2176_v14  ;;  %v2199_v48 = vsub.f32 %v6475_v31, %v2180_v15  ;;  %v2200_v49 = vsub.f32 %v6486_v12, %v2184_v33 }
 0x7a5   : > { %5501 = vrsqrt.f32 %v2201_v57 }
 0x7af   : > { %v5502_v45 = vpop.eup %5501 }
 0x7b0   : > { %v2207_v50 = vrot.slane %v5502_v45, %v6572_v62  ;;  %v2211_v51 = vrot.slane %v5502_v45, %v6575_v63  ;;  %v2215_v21 = vrot.slane %v5502_v45, %v6578_v0  ;;  %v2219_v26 = vrot.slane %v5502_v45, %v6581_v1 }
 0x7b1   : > { %v2223_v27 = vrot.slane %v5502_v45, %v6584_v2  ;;  %v2227_v30 = vrot.slane %v5502_v45, %v6587_v4  ;;  %v2231_v28 = vrot.slane %v5502_v45, %v6590_v5  ;;  %v2235_v8 = vrot.slane %v5502_v45, %v6593_v7 }
 0x7b2   : > { %v2244_v52 = vmul.f32 %v2207_v50, %v2193_v41  ;;  %v2245_v31 = vmul.f32 %v2211_v51, %v2194_v42  ;;  %v2246_v53 = vmul.f32 %v2215_v21, %v2195_v43  ;;  %v2247_v12 = vmul.f32 %v2219_v26, %v2196_v44 }
 0x7b3   : > { %v2248_v54 = vmul.f32 %v2223_v27, %v2197_v46  ;;  %v2249_v55 = vmul.f32 %v2227_v30, %v2198_v47  ;;  %v2250_v56 = vmul.f32 %v2231_v28, %v2199_v48  ;;  %v2251_v57 = vmul.f32 %v2235_v8, %v2200_v49  ;;  %v2599_v47 = vld [vmem:[%s826_s16] sm:$0xff]  ;;  %s5853_s16 = smov [#allocation17]  }
 0x7b4   : > { %v2315_v58 = vmul.f32 %v2281_v11, %v2244_v52  ;;  %v2316_v59 = vmul.f32 %v2295_v18, %v2245_v31  ;;  %v2317_v60 = vmul.f32 %v2303_v34, %v2246_v53  ;;  %v2318_v61 = vmul.f32 %v2305_v36, %v2247_v12 }
 0x7b5   : > { %v2319_v9 = vmul.f32 %v2288_v17, %v2248_v54  ;;  %v2320_v19 = vmul.f32 %v2302_v20, %v2249_v55  ;;  %v2321_v10 = vmul.f32 %v2304_v35, %v2250_v56  ;;  %v2322_v13 = vmul.f32 %v2306_v37, %v2251_v57 }
 0x7b6   : > { %v6627_v32 = vadd.f32 %v2352_v22, %v2315_v58  ;;  %v6629_v14 = vadd.f32 %v2366_v24, %v2316_v59  ;;  %v6631_v15 = vadd.f32 %v2374_v16, %v2317_v60  ;;  %v6633_v33 = vadd.f32 %v2376_v39, %v2318_v61  ;;  %v2510_v39 = vpop.permute.xlu0 %2509 }
 0x7b7   : > { %v6635_v41 = vadd.f32 %v2359_v23, %v2319_v9  ;;  %v6637_v42 = vadd.f32 %v2373_v29, %v2320_v19  ;;  %v6639_v11 = vadd.f32 %v2375_v38, %v2321_v10  ;;  %v6641_v18 = vadd.f32 %v2377_v40, %v2322_v13 }
 0x7b8   : > { %v2402_v17 = vcombine.low %v6627_v32, %v6629_v14  ;;  %v2403_v20 = vcombine.low %v6631_v15, %v6633_v33  ;;  %v5852_v44 = vmov 0  }
 0x7b9   : > { %v2404_v22 = vcombine.low %v6635_v41, %v6637_v42  ;;  %v2405_v24 = vcombine.low %v6639_v11, %v6641_v18  ;;  %5484 = vset.pattern.permute.xlu0 %v5852_v44 }
 0x7ba   : > { %v2412_v23 = vrot.slane %v2402_v17, %v6342_v25  ;;  %v2419_v29 = vrot.slane %v2403_v20, %v6342_v25 }
 0x7bb   : > { %v2426_v34 = vrot.slane %v2404_v22, %v6342_v25  ;;  %v2433_v35 = vrot.slane %v2405_v24, %v6342_v25 }
 0x7bc   : > { %v2434_v36 = vcombine.low %v2412_v23, %v2419_v29 }
 0x7bd   : > { %v2435_v37 = vcombine.low %v2426_v34, %v2433_v35 }
 0x7be   : > { %v2442_v16 = vrot.slane %v2434_v36, %v6342_v25 }
 0x7bf   : > { %v2449_v38 = vrot.slane %v2435_v37, %v6342_v25  ;;  %v3604_v37 = vld [vmem:[%s830_s27] sm:$0xff]  ;;  %s7238_s27 = sld [smem:[#allocation47_spill]] }
 0x7c1   : > { %v2450_v40 = vcombine.low %v2442_v16, %v2449_v38 }
 0x7c3   : > { %v2512_v43 = vsel %vm912_vm1, %v2450_v40, %v2510_v39 }
 0x7c4   : > { %5225 = vmatmul.mubr.msk.f32.vlgmr.msra.gmra.mrb[14].mxu0 %vm2521_vm3, %v2512_v43 }
 0x7c5   : > { %5249 = vmatprep.mubr.msk.f32.mxu0 %vm5837_vm0, %v5838_v6 }
 0x897   : > { %v6663_v45 = vpop.f32.mrb[14].mxu0 }
 0x898   : > { %2702 = vrot.lane.b32.xlu0 %v6663_v45, %s5841_s30  ;;  %2623 = vrot.lane.b32.xlu1 %v6663_v45, %s5840_s24  ;;  %v5226_v46 = vpop.f32.mrb[15].mxu0  ;;  %s2595_s24 = sld [smem:[#allocation15]]  ;;  %s7227_s30 = scalar_lea.vmem [#allocation8], %s6249_s25 }
 0x899   : > { %v5021_v28 = vld [vmem:[%s7227_s30] ss:$0 sm:$0xff] }
 0x89c   : > { %2700 = vrot.lane.b32.xlu0 %v6663_v45, %s5843_s15  ;;  %2781 = vrot.lane.b32.xlu1 %v6663_v45, %s5842_s0  ;;  %s5018_s0 = sld [smem:[#allocation15 + $0x1]]  ;;  %s5019_s15 = sld [smem:[#allocation15 + $0x2]] }
 0x89e   : > { %v2613_v52 = vstv %s2595_s24  ;;  %s7229_s24 = sld [smem:[#allocation37_spill]] }
 0x8a0   : > { %2860 = vrot.lane.b32.xlu1 %v6663_v45, %s5844_s5  ;;  %2603 = vperm.xlu0 %5484, %v2599_v47   ;;  %s5020_s5 = sld [smem:[#allocation15 + $0x3]]  ;;  %v3599_v47 = vstv %s3591_s7  ;;  %s7234_s7 = sld [smem:[#allocation41_spill]] }
 0x8a2   : > { %v2615_v12 = vstv %s5018_s0  ;;  %v2618_v55 = vstv %s5019_s15  ;;  %s5042_s0 = sld [smem:[#allocation14 + $0x4]]  ;;  %s5044_s15 = sld [smem:[#allocation14 + $0x6]] }
 0x8a4   : > { %2779 = vrot.lane.b32.xlu0 %v6663_v45, %s5845_s9  ;;  %s5040_s9 = sld [smem:[#allocation14 + $0x2]]  ;;  %s834_s30 = scalar_lea.vmem %s7229_s24, %s6665_s3 }
 0x8a5   : > { %v3598_v46 = vld [vmem:[%s834_s30] sm:$0xff]  ;;  %s5043_s3 = sld [smem:[#allocation14 + $0x5]]  ;;  %s7237_s24 = sld [smem:[#allocation44_spill]] }
 0x8a6   : > { %v2620_v57 = vstv %s5020_s5 }
 0x8a8   : > { %2858 = vrot.lane.b32.xlu0 %v6663_v45, %s5846_s23  ;;  %s5041_s23 = sld [smem:[#allocation14 + $0x3]] }
 0x8aa   : > { %v3605_v16 = vstv %s5040_s9  ;;  %s7230_s9 = smov 56  }
 0x8ab   : > { %v3606_v38 = vmul.f32 %v3605_v16, %v3604_v37  ;;  %s3621_s5 = smul.f32 2.0, %s5043_s3 }
 0x8ad   : > { %v3624_v37 = vstv %s3621_s5  ;;  %s7235_s5 = sld [smem:[#allocation43_spill]] }
 0x8ae   : > { %v3607_v39 = vstv %s5041_s23  ;;  %s7231_s23 = smov 64  }
 0x8af   : > { %v3608_v40 = vadd.f32 %v3607_v39, %v3606_v38 }
 0x8b1   : > { %v3609_v43 = vmax.f32 %v3608_v40, 0.0 }
 0x8b3   : > { %v3610_v44 = vadd.f32 1.0, %v3609_v43 }
 0x90a   : > { %v2624_v48 = vpop.permute.xlu1 %2623  ;;  %v2703_v49 = vpop.permute.xlu0 %2702 }
 0x90b   : > { %5228 = vmatpush3.xpose.msk.msra.mxu1 %vm988_vm2, %v2624_v48  ;;  %v3600_v48 = vmul.f32 %v3599_v47, %v3598_v46 }
 0x90c   : > { %5232 = vmatprep.subr.mxu1 %v5838_v6 }
 0x90e   : > { %5230 = vmatmul.mubr.msk.f32.vlgmr.msra.gmra.mrb[12].mxu1 %vm988_vm2, %v6663_v45  ;;  %v2701_v50 = vpop.permute.xlu0 %2700  ;;  %v2782_v51 = vpop.permute.xlu1 %2781 }
 0x90f   : > { %5233 = vmatpush3.xpose.msk.msra.mxu1 %vm988_vm2, %v2703_v49  ;;  %5234 = vmatprep.mubr.msk.f32.mxu1 %vm5837_vm0, %v5838_v6  ;;  %v3601_v49 = vstv %s5039_s12  ;;  %s7236_s12 = sld [smem:[#allocation42_spill]] }
 0x910   : > { %5237 = vmatprep.subr.mxu1 %v5838_v6 }
 0x912   : > { %5235 = vmatmul.mubr.msk.f32.vlgmr.msra.gmra.mrb[14].mxu1 %vm988_vm2, %v2701_v50  ;;  %v2861_v27 = vpop.permute.xlu1 %2860  ;;  %v3602_v50 = vadd.f32 %v3601_v49, %v3600_v48  ;;  %v3134_v49 = vld [vmem:[#allocation11 + $0x8] sm:$0xff] }
 0x913   : > { %5238 = vmatpush3.xpose.msk.msra.mxu1 %vm988_vm2, %v2782_v51  ;;  %5239 = vmatprep.mubr.msk.f32.mxu1 %vm5837_vm0, %v5838_v6 }
 0x914   : > { %5242 = vmatprep.subr.mxu1 %v5838_v6  ;;  %v3603_v51 = vmax.f32 %v3602_v50, 0.0  ;;  %v3057_v50 = vld [vmem:[#allocation11] sm:$0xff] }
 0x91f   : > { %v2604_v21 = vpop.permute.xlu0 %2603 }
 0x920   : > { %v2612_v8 = vsub.f32 %v2604_v21, %v5021_v28 }
 0x922   : > { %v2614_v31 = vadd.f32 %v2613_v52, %v2612_v8 }
 0x923   : > { %v2780_v26 = vpop.permute.xlu0 %2779 }
 0x924   : > { %5240 = vmatmul.mubr.msk.f32.vlgmr.msra.gmra.mrb[16].mxu1 %vm988_vm2, %v2780_v26  ;;  %5503 = vrcp.f32 %v2614_v31 }
 0x925   : > { %5243 = vmatpush3.xpose.msk.msra.mxu1 %vm988_vm2, %v2861_v27  ;;  %5244 = vmatprep.mubr.msk.f32.mxu1 %vm5837_vm0, %v5838_v6  ;;  %5505 = vrcp.f32 %v3610_v44  ;;  %v3613_v27 = vstv %s5042_s0 }
 0x926   : > { %5252 = vmatprep.subr.mxu1 %v5838_v6 }
 0x927   : > { %v2859_v30 = vpop.permute.xlu0 %2858 }
 0x928   : > { %5245 = vmatmul.mubr.msk.f32.vlgmr.msra.gmra.mrb[18].mxu1 %vm988_vm2, %v2859_v30 }
 0x929   : > { %5254 = vmatprep.mubr.msk.f32.mxu1 %vm5837_vm0, %v5838_v6 }
 0x92e   : > { %v5504_v53 = vpop.eup %5503 }
 0x92f   : > { %v2617_v54 = vmul.f32 %v5504_v53, %v2615_v12  ;;  %v5506_v21 = vpop.eup %5505 }
 0x930   : > { %v3612_v26 = vmul.f32 %v5506_v21, %v3603_v51 }
 0x931   : > { %v2619_v56 = vmul.f32 %v2618_v55, %v2617_v54 }
 0x932   : > { %v3614_v30 = vmul.f32 %v3613_v27, %v3612_v26 }
 0x933   : > { %v2621_v58 = vadd.f32 %v2620_v57, %v2619_v56 }
 0x934   : > { %v3615_v28 = vsub.f32 0.0, %v3614_v30 }
 0x936   : > { %v3616_v53 = vmul.f32 1.442695, %v3615_v28 }
 0x9e1   : > { %v2695_v59 = vpop.f32.mrb[12].mxu1 }
 0x9e2   : > { %v2699_v60 = vmul.f32 %v2695_v59, %v2621_v58  ;;  %v5231_v61 = vpop.f32.mrb[13].mxu1 }
 0x9e4   : > { %v2937_v17 = vsel %vm988_vm2, %v2699_v60, -inf }
 0x9e5   : > { %v2774_v9 = vpop.f32.mrb[14].mxu1 }
 0x9e6   : > { %v2778_v19 = vmul.f32 %v2774_v9, %v2621_v58  ;;  %v5236_v10 = vpop.f32.mrb[15].mxu1 }
 0x9e8   : > { %v2940_v13 = vsel %vm988_vm2, %v2778_v19, -inf }
 0x9e9   : > { %2941 = vmax.xlane.f32.xlu1 %v2940_v13 }
 0x9ed   : > { %2938 = vmax.xlane.f32.xlu1 %v2937_v17 }
 0x9f7   : > { %v2853_v20 = vpop.f32.mrb[16].mxu1 }
 0x9f8   : > { %v2857_v22 = vmul.f32 %v2853_v20, %v2621_v58  ;;  %v5241_v24 = vpop.f32.mrb[17].mxu1 }
 0x9fa   : > { %v2943_v23 = vsel %vm988_vm2, %v2857_v22, -inf }
 0x9fb   : > { %2944 = vmax.xlane.f32.xlu1 %v2943_v23  ;;  %v2932_v29 = vpop.f32.mrb[18].mxu1 }
 0x9fc   : > { %v2936_v34 = vmul.f32 %v2932_v29, %v2621_v58  ;;  %v5246_v35 = vpop.f32.mrb[19].mxu1 }
 0x9fe   : > { %v2946_v36 = vsel %vm988_vm2, %v2936_v34, -inf }
 0x9ff   : > { %2947 = vmax.xlane.f32.xlu1 %v2946_v36 }
 0xa76   : > { %v2942_v8 = vpop.xlane.xlu1 %2941 }
 0xa77   : > { %v2950_v52 = vsub.f32 %v2778_v19, %v2942_v8 }
 0xa79   : > { %v2955_v31 = vmul.f32 1.442695, %v2950_v52 }
 0xa7a   : > { %v2939_v12 = vpop.xlane.xlu1 %2938 }
 0xa7b   : > { %5507 = vpow2.f32 %v2955_v31  ;;  %v2949_v54 = vsub.f32 %v2699_v60, %v2939_v12 }
 0xa7c   : > { %5509 = vpow2.f32 %v3616_v53 }
 0xa7d   : > { %v2953_v55 = vmul.f32 1.442695, %v2949_v54 }
 0xa7f   : > { %5511 = vpow2.f32 %v2953_v55  ;;  %v3357_v55 = vld [vmem:[#allocation11 + $0x10] sm:$0xff] }
 0xa85   : > { %v5508_v56 = vpop.eup %5507 }
 0xa86   : > { %v2964_v57 = vsel %vm988_vm2, %v5508_v56, 0.0  ;;  %v5510_v58 = vpop.eup %5509 }
 0xa87   : > { %2965 = vadd.xlane.f32.xlu0 %v2964_v57  ;;  %v3618_v17 = vadd.f32 1.0, %v5510_v58  ;;  %v3508_v58 = vld [vmem:[#allocation11 + $0x18] sm:$0xff] }
 0xa88   : > { %v2945_v59 = vpop.xlane.xlu1 %2944 }
 0xa89   : > { %v5512_v61 = vpop.eup %5511  ;;  %v2951_v9 = vsub.f32 %v2857_v22, %v2945_v59  ;;  %v3622_v22 = vstv %s5044_s15 }
 0xa8a   : > { %v2961_v10 = vsel %vm988_vm2, %v5512_v61, 0.0 }
 0xa8b   : > { %v2957_v13 = vmul.f32 1.442695, %v2951_v9  ;;  %2962 = vadd.xlane.f32.xlu1 %v2961_v10 }
 0xa8c   : > { %v2948_v19 = vpop.xlane.xlu1 %2947 }
 0xa8d   : > { %5513 = vpow2.f32 %v2957_v13  ;;  %v2952_v20 = vsub.f32 %v2936_v34, %v2948_v19 }
 0xa8e   : > { %5515 = vrcp.f32 %v3618_v17 }
 0xa8f   : > { %v2959_v60 = vmul.f32 1.442695, %v2952_v20 }
 0xa91   : > { %5517 = vpow2.f32 %v2959_v60 }
 0xa97   : > { %v5514_v24 = vpop.eup %5513 }
 0xa98   : > { %v2967_v23 = vsel %vm988_vm2, %v5514_v24, 0.0  ;;  %v5516_v29 = vpop.eup %5515 }
 0xa99   : > { %2968 = vadd.xlane.f32.xlu1 %v2967_v23  ;;  %v3623_v34 = vadd.f32 %v5516_v29, %v3622_v22  ;;  %v5038_v29 = vld [vmem:[#allocation12] ss:$0 sm:$0xff] }
 0xa9b   : > { %v5518_v35 = vpop.eup %5517  ;;  %v3625_v16 = vmul.f32 %v3624_v37, %v3623_v34 }
 0xa9c   : > { %v2970_v36 = vsel %vm988_vm2, %v5518_v35, 0.0 }
 0xa9d   : > { %3058 = vrot.lane.b32.xlu0 %v6663_v45, %s7230_s9  ;;  %2971 = vadd.xlane.f32.xlu1 %v2970_v36  ;;  %v3626_v38 = vadd.f32 1.0, %v3625_v16  ;;  %s5058_s9 = sshll.u32 %s5982_s2, 4  ;;  %s7239_s2 = sld [smem:[#allocation31_spill]] }
 0xaa1   : > { %2981 = vrot.lane.b32.xlu0 %v6663_v45, %s7231_s23  ;;  %s822_s23 = scalar_lea.vmem [#allocation17], %s6252_s13  ;;  %s4760_s13 = scalar_lea.sflag [#allocation4], %s6249_s25 }
 0xaa3   : > { %p7240_p5 = scmp.ne.s32.totalorder %s7239_s2, 0 }
 0xaa5   : > { %3432 = vrot.lane.b32.xlu0 %v6663_v45, %s7232_s21  ;;  %s4772_s21 = sshll.u32 %s822_s23, 4  ;;  %s7045_s21 = int_to_ptr.vmem [resolvable:$true] %s4772_s21 }
 0xaa6   : > { %s5735_s4 = scalar_lea.vmem %s7045_s21, 128 }
 0xaa7   : > { %p5736_p12 = scmp.ne.s32.totalorder %s7045_s21, %s5735_s4 }
 0xaa9   : > { %3629 = vperm.xlu0 %5484, %v3626_v38   ;;  %p5737_p10 = pnand %p5736_p12, %p7240_p5 }
 0xaab   : > { %p5738_p13 = pneg %p5737_p10 }
 0xaae   : > { %3281 = vrot.lane.b32.xlu1 %v6663_v45, %s7233_s20 }
 0xb14   : > { %v2966_v39 = vpop.xlane.xlu0 %2965 }
 0xb15   : > { %5519 = vrcp.f32 %v2966_v39 }
 0xb18   : > { %v2963_v40 = vpop.xlane.xlu1 %2962  ;;  %v3059_v43 = vpop.permute.xlu0 %3058 }
 0xb19   : > { %5521 = vrcp.f32 %v2963_v40  ;;  %5253 = vmatpush3.msra.mxu1 %v3059_v43 }
 0xb1a   : > { %5262 = vmatprep.subr.mxu1 %v5838_v6 }
 0xb1c   : > { %v2982_v44 = vpop.permute.xlu0 %2981 }
 0xb1d   : > { %5248 = vmatpush3.msra.mxu0 %v2982_v44 }
 0xb1e   : > { %5257 = vmatprep.subr.mxu0 %v5838_v6 }
 0xb1f   : > { %v5520_v46 = vpop.eup %5519 }
 0xb20   : > { %v2976_v47 = vmul.f32 %v5520_v46, %v5508_v56  ;;  %v3433_v53 = vpop.permute.xlu0 %3432 }
 0xb22   : > { %5255 = vmatmul.mubr.msk.f32.vlgmr.msra.gmra.mrb[20].mxu1 %vm988_vm2, %v2976_v47 }
 0xb23   : > { %v5522_v48 = vpop.eup %5521  ;;  %5264 = vmatprep.mubr.msk.f32.mxu1 %vm5837_vm0, %v5838_v6  ;;  %5263 = vmatpush3.msra.mxu1 %v3057_v50 }
 0xb24   : > { %v2974_v45 = vmul.f32 %v5522_v48, %v5512_v61  ;;  %5272 = vmatprep.subr.mxu1 %v5838_v6 }
 0xb26   : > { %5250 = vmatmul.mubr.msk.f32.vlgmr.msra.gmra.mrb[16].mxu0 %vm988_vm2, %v2974_v45  ;;  %v2969_v51 = vpop.xlane.xlu1 %2968 }
 0xb27   : > { %5258 = vmatpush3.msra.mxu0 %v3134_v49  ;;  %5259 = vmatprep.mubr.msk.f32.mxu0 %vm5837_vm0, %v5838_v6  ;;  %5523 = vrcp.f32 %v2969_v51 }
 0xb28   : > { %5267 = vmatprep.subr.mxu0 %v5838_v6  ;;  %v3630_v34 = vpop.permute.xlu0 %3629 }
 0xb2a   : > { %v2972_v21 = vpop.xlane.xlu1 %2971 }
 0xb2b   : > { %5525 = vrcp.f32 %v2972_v21 }
 0xb2e   : > { %v3282_v30 = vpop.permute.xlu1 %3281 }
 0xb31   : > { %v5524_v26 = vpop.eup %5523 }
 0xb32   : > { %v2978_v8 = vmul.f32 %v5524_v26, %v5514_v24 }
 0xb35   : > { %v5526_v52 = vpop.eup %5525 }
 0xb36   : > { %v2980_v54 = vmul.f32 %v5526_v52, %v5518_v35 }
 0xbf5   : > { %v3130_v27 = vpop.f32.mrb[20].mxu1 }
 0xbf6   : > { %v5256_v28 = vpop.f32.mrb[21].mxu1  ;;  %5260 = vmatmul.mubr.msk.f32.vlgmr.msra.gmra.mrb[18].mxu0 %vm988_vm2, %v3130_v27 }
 0xbf7   : > { %5268 = vmatpush3.msra.mxu0 %v3282_v30  ;;  %5269 = vmatprep.mubr.msk.f32.mxu0 %vm5837_vm0, %v5838_v6 }
 0xbf8   : > { %5277 = vmatprep.subr.mxu0 %v5838_v6 }
 0xbf9   : > { %v3053_v31 = vpop.f32.mrb[16].mxu0 }
 0xbfa   : > { %v5251_v12 = vpop.f32.mrb[17].mxu0  ;;  %5265 = vmatmul.mubr.msk.f32.vlgmr.msra.gmra.mrb[22].mxu1 %vm988_vm2, %v3053_v31  ;;  %5270 = vmatmul.mubr.msk.f32.vlgmr.msra.gmra.mrb[20].mxu0 %vm988_vm2, %v2978_v8 }
 0xbfb   : > { %5278 = vmatpush3.msra.mxu0 %v3433_v53  ;;  %5279 = vmatprep.mubr.msk.f32.mxu0 %vm5837_vm0, %v5838_v6 }
 0xbfc   : > { %5274 = vmatprep.mubr.msk.f32.mxu1 %vm5837_vm0, %v5838_v6  ;;  %5335 = vmatprep.subr.bf16.mxu0 %v5836_v3 }
 0xbfd   : > { %5273 = vmatpush3.msra.mxu1 %v3357_v55 }
 0xbfe   : > { %5280 = vmatmul.mubr.msk.f32.vlgmr.msra.gmra.mrb[22].mxu0 %vm988_vm2, %v2980_v54  ;;  %5282 = vmatprep.subr.mxu1 %v5838_v6 }
 0xbff   : > { %5295 = vmatprep.mubr.msk.f32.mxu0 %vm5837_vm0, %v5838_v6 }
 0xcc9   : > { %v3204_v56 = vpop.f32.mrb[18].mxu0 }
 0xcca   : > { %v5261_v57 = vpop.f32.mrb[19].mxu0 }
 0xccd   : > { %v3277_v59 = vpop.f32.mrb[22].mxu1  ;;  %v3353_v61 = vpop.f32.mrb[20].mxu0 }
 0xcce   : > { %v3278_v9 = vadd.f32 %v3277_v59, %v3204_v56  ;;  %v5266_v10 = vpop.f32.mrb[23].mxu1  ;;  %v5271_v13 = vpop.f32.mrb[21].mxu0  ;;  %5275 = vmatmul.mubr.msk.f32.vlgmr.msra.gmra.mrb[24].mxu1 %vm988_vm2, %v3353_v61 }
 0xccf   : > { %5283 = vmatpush3.msra.mxu1 %v3508_v58  ;;  %5284 = vmatprep.mubr.msk.f32.mxu1 %vm5837_vm0, %v5838_v6 }
 0xcd0   : > { %5341 = vmatprep.subr.bf16.mxu1 %v5836_v3 }
 0xcd1   : > { %v3504_v19 = vpop.f32.mrb[22].mxu0 }
 0xcd2   : > { %v5281_v17 = vpop.f32.mrb[23].mxu0  ;;  %5285 = vmatmul.mubr.msk.f32.vlgmr.msra.gmra.mrb[26].mxu1 %vm988_vm2, %v3504_v19 }
 0xcd3   : > { %5314 = vmatprep.mubr.msk.f32.mxu1 %vm5837_vm0, %v5838_v6 }
 0xda1   : > { %v3427_v20 = vpop.f32.mrb[24].mxu1 }
 0xda2   : > { %v3431_v60 = vadd.f32 %v3427_v20, %v3278_v9  ;;  %v5276_v24 = vpop.f32.mrb[25].mxu1 }
 0xda5   : > { %v3578_v23 = vpop.f32.mrb[26].mxu1 }
 0xda6   : > { %v3582_v22 = vadd.f32 %v3578_v23, %v3431_v60  ;;  %v5286_v35 = vpop.f32.mrb[27].mxu1 }
 0xda8   : > { %v3590_v36 = vadd.f32 %v5038_v29, %v3582_v22 }
 0xdaa   : > { %v3632_v37 = vmul.f32 %v3630_v34, %v3590_v36 }
 0xdac   : > { %v3634_v16 = vcombine.high %v3632_v37, %v3632_v37  ;;  %v3641_v38 = vrot.slane %v3632_v37, %v6342_v25 }
 0xdae   : > { %v3648_v39 = vrot.slane %v3634_v16, %v6342_v25  ;;  %v3649_v40 = vcombine.high %v3641_v38, %v3641_v38  ;;  %v3657_v43 = vrot.slane %v3641_v38, %v6342_v25 }
 0xdb0   : > { %v3650_v44 = vcombine.high %v3648_v39, %v3648_v39  ;;  %v3664_v6 = vrot.slane %v3648_v39, %v6342_v25  ;;  %v3671_v46 = vrot.slane %v3649_v40, %v6342_v25  ;;  %v3679_v47 = vcombine.high %v3657_v43, %v3657_v43  ;;  %v4077_v40 = vld [vmem:[%s7234_s7] sm:$0xff] }
 0xdb1   : > { %v6770_v48 = vadd.f32 %v3657_v43, %v6627_v32  ;;  %v4078_v43 = vld [vmem:[%s7234_s7 + $0x8] sm:$0xff] }
 0xdb2   : > { %v3678_v45 = vrot.slane %v3650_v44, %v6342_v25  ;;  %v3680_v49 = vcombine.high %v3664_v6, %v3664_v6  ;;  %v3681_v50 = vcombine.high %v3671_v46, %v3671_v46  ;;  %v6774_v51 = vadd.f32 %v3671_v46, %v6629_v14  ;;  %v4079_v44 = vld [vmem:[%s7234_s7 + $0x10] sm:$0xff]  ;;  %v4080_v46 = vld [vmem:[%s7234_s7 + $0x18] sm:$0xff] }
 0xdb3   : > { %v6777_v21 = vadd.f32 %v3679_v47, %v6631_v15  ;;  %v6780_v26 = vadd.f32 %v3664_v6, %v6635_v41  ;;  %v3761_v15 = vmul.f32 %v6770_v48, %v6770_v48  ;;  %v5336_v6 = vpack.c.bf16 %v4078_v43, %v4077_v40 }
 0xdb4   : > { %v3682_v27 = vcombine.high %v3678_v45, %v3678_v45  ;;  %v6783_v30 = vadd.f32 %v3681_v50, %v6633_v33  ;;  %v6786_v32 = vadd.f32 %v3678_v45, %v6637_v42  ;;  %v6789_v28 = vadd.f32 %v3680_v49, %v6639_v11  ;;  %v4218_v45 = vld [vmem:[%s7235_s5] sm:$0xff]  ;;  %v4219_v49 = vld [vmem:[%s7235_s5 + $0x8] sm:$0xff]  ;;  %v4220_v50 = vld [vmem:[%s7235_s5 + $0x10] sm:$0xff] }
 0xdb5   : > { %v3707_v14 = vcombine.low %v6770_v48, %v6774_v51  ;;  %v3762_v41 = vmul.f32 %v6774_v51, %v6774_v51  ;;  %v3763_v8 = vmul.f32 %v6777_v21, %v6777_v21  ;;  %v3765_v53 = vmul.f32 %v6780_v26, %v6780_v26  ;;  %5337 = vmatpush3.bf16.msra.mxu0 %v5336_v6 }
 0xdb6   : > { %v6800_v33 = vadd.f32 %v3682_v27, %v6641_v18  ;;  %v3708_v42 = vcombine.low %v6777_v21, %v6783_v30  ;;  %v3709_v11 = vcombine.low %v6780_v26, %v6786_v32  ;;  %v3764_v52 = vmul.f32 %v6783_v30, %v6783_v30  ;;  %5338 = vmatprep.subr.bf16.mxu0 %v5836_v3 }
 0xdb7   : > { %v3717_v31 = vrot.slane %v3707_v14, %v6342_v25  ;;  %v3766_v12 = vmul.f32 %v6786_v32, %v6786_v32  ;;  %v3777_v54 = vcombine.low %v3761_v15, %v3762_v41  ;;  %v3767_v56 = vmul.f32 %v6789_v28, %v6789_v28  ;;  %v4221_v14 = vld [vmem:[%s7235_s5 + $0x18] sm:$0xff]  ;;  %v4222_v41 = vld [vmem:[%s7235_s5 + $0x20] sm:$0xff] }
 0xdb8   : > { %v3710_v18 = vcombine.low %v6789_v28, %v6800_v33  ;;  %v3724_v55 = vrot.slane %v3708_v42, %v6342_v25  ;;  %v3768_v57 = vmul.f32 %v6800_v33, %v6800_v33  ;;  %v3778_v58 = vcombine.low %v3763_v8, %v3764_v52  ;;  %v4223_v8 = vld [vmem:[%s7235_s5 + $0x28] sm:$0xff]  ;;  %v5048_v52 = vld [vmem:[%s7225_s29 + $0x1] ss:$0 sm:$0xff] }
 0xdb9   : > { %v3779_v59 = vcombine.low %v3765_v53, %v3766_v12  ;;  %v3731_v61 = vrot.slane %v3709_v11, %v6342_v25  ;;  %v3787_v19 = vrot.slane %v3777_v54, %v6342_v25  ;;  %v5339_v47 = vpack.c.bf16 %v4080_v46, %v4079_v44  ;;  %v5046_v11 = vld [vmem:[%s7223_s17 + $0x1] ss:$0 sm:$0xff] }
 0xdba   : > { %v3738_v9 = vrot.slane %v3710_v18, %v6342_v25  ;;  %v3739_v10 = vcombine.low %v3717_v31, %v3724_v55  ;;  %v3780_v13 = vcombine.low %v3767_v56, %v3768_v57  ;;  %v3794_v17 = vrot.slane %v3778_v58, %v6342_v25 }
 0xdbb   : > { %v3801_v60 = vrot.slane %v3779_v59, %v6342_v25  ;;  %5340 = vmatpush3.bf16.msra.mxu0 %v5339_v47  ;;  %v5342_v27 = vpack.c.bf16 %v4219_v49, %v4218_v45  ;;  %v5345_v15 = vpack.c.bf16 %v4221_v14, %v4220_v50  ;;  %v5348_v42 = vpack.c.bf16 %v4223_v8, %v4222_v41 }
 0xdbc   : > { %v3740_v20 = vcombine.low %v3731_v61, %v3738_v9  ;;  %v3808_v24 = vrot.slane %v3780_v13, %v6342_v25  ;;  %v3809_v23 = vcombine.low %v3787_v19, %v3794_v17  ;;  %v3747_v29 = vrot.slane %v3739_v10, %v6342_v25 }
 0xdbd   : > { %5343 = vmatpush3.bf16.msra.mxu1 %v5342_v27  ;;  %v3940_v53 = vcombine.high %v5046_v11, %v5046_v11  ;;  %v4012_v54 = vcombine.high %v5048_v52, %v5048_v52  ;;  %v3947_v57 = vrot.slane %v5046_v11, %v6342_v25  ;;  %v4019_v59 = vrot.slane %v5048_v52, %v6342_v25 }
 0xdbe   : > { %v3754_v22 = vrot.slane %v3740_v20, %v6342_v25  ;;  %v3810_v35 = vcombine.low %v3801_v60, %v3808_v24  ;;  %v3817_v34 = vrot.slane %v3809_v23, %v6342_v25  ;;  %5344 = vmatprep.subr.bf16.mxu1 %v5836_v3 }
 0xdbf   : > { %v3954_v58 = vrot.slane %v3940_v53, %v6342_v25  ;;  %v4026_v61 = vrot.slane %v4012_v54, %v6342_v25  ;;  %v3955_v10 = vcombine.high %v3947_v57, %v3947_v57  ;;  %v4027_v19 = vcombine.high %v4019_v59, %v4019_v59 }
 0xdc0   : > { %v3755_v36 = vcombine.low %v3747_v29, %v3754_v22  ;;  %v3824_v37 = vrot.slane %v3810_v35, %v6342_v25  ;;  %v3963_v20 = vrot.slane %v3947_v57, %v6342_v25  ;;  %v4035_v29 = vrot.slane %v4019_v59, %v6342_v25 }
 0xdc1   : > { %5346 = vmatpush3.bf16.msra.mxu1 %v5345_v15  ;;  %v3956_v13 = vcombine.high %v3954_v58, %v3954_v58  ;;  %v4028_v17 = vcombine.high %v4026_v61, %v4026_v61  ;;  %v3970_v60 = vrot.slane %v3954_v58, %v6342_v25  ;;  %v3977_v24 = vrot.slane %v3955_v10, %v6342_v25 }
 0xdc2   : > { %v3757_v16 = vsel %vm912_vm1, %v3755_v36, 0.0  ;;  %v3825_v38 = vcombine.low %v3817_v34, %v3824_v37  ;;  %5347 = vmatprep.subr.bf16.mxu1 %v5836_v3  ;;  %v4042_v22 = vrot.slane %v4026_v61, %v6342_v25  ;;  %v4049_v35 = vrot.slane %v4027_v19, %v6342_v25 }
 0xdc3   : > { %3758 = vadd.xlane.f32.xlu0 %v3757_v16  ;;  %v3984_v23 = vrot.slane %v3956_v13, %v6342_v25  ;;  %v4056_v36 = vrot.slane %v4028_v17, %v6342_v25  ;;  %v3985_v6 = vcombine.high %v3963_v20, %v3963_v20  ;;  %v3986_v46 = vcombine.high %v3970_v60, %v3970_v60 }
 0xdc4   : > { %v3827_v39 = vsel %vm912_vm1, %v3825_v38, 0.0  ;;  %v3987_v47 = vcombine.high %v3977_v24, %v3977_v24  ;;  %v4057_v49 = vcombine.high %v4035_v29, %v4035_v29  ;;  %v4058_v50 = vcombine.high %v4042_v22, %v4042_v22 }
 0xdc5   : > { %3828 = vadd.xlane.f32.xlu1 %v3827_v39  ;;  %5349 = vmatpush3.bf16.msra.mxu1 %v5348_v42  ;;  %v3988_v45 = vcombine.high %v3984_v23, %v3984_v23  ;;  %v4059_v27 = vcombine.high %v4049_v35, %v4049_v35  ;;  %v4060_v14 = vcombine.high %v4056_v36, %v4056_v36 }
 0xdc6   : > { %5350 = vmatprep.subr.bf16.mxu1 %v5836_v3 }
 0xe50   : > { %v3759_v31 = vpop.xlane.xlu0 %3758 }
 0xe51   : > { %v3760_v12 = vmul.f32 0.03125, %v3759_v31 }
 0xe52   : > { %v3829_v18 = vpop.xlane.xlu1 %3828 }
 0xe53   : > { %v3830_v55 = vmul.f32 0.03125, %v3829_v18  ;;  %v3831_v56 = vmul.f32 %v3760_v12, %v3760_v12  ;;  %v3837_v34 = vrot.slane %v3760_v12, %v6572_v62  ;;  %v3841_v37 = vrot.slane %v3760_v12, %v6575_v63 }
 0xe54   : > { %v3845_v16 = vrot.slane %v3760_v12, %v6578_v0  ;;  %v3849_v38 = vrot.slane %v3760_v12, %v6581_v1  ;;  %v3853_v39 = vrot.slane %v3760_v12, %v6584_v2  ;;  %v3857_v40 = vrot.slane %v3760_v12, %v6587_v4 }
 0xe55   : > { %v3832_v3 = vsub.f32 %v3830_v55, %v3831_v56  ;;  %v3861_v43 = vrot.slane %v3760_v12, %v6590_v5  ;;  %v3865_v44 = vrot.slane %v3760_v12, %v6593_v7  ;;  %v3874_v15 = vsub.f32 %v6770_v48, %v3837_v34 }
 0xe56   : > { %v3875_v41 = vsub.f32 %v6774_v51, %v3841_v37  ;;  %v3876_v8 = vsub.f32 %v6777_v21, %v3845_v16  ;;  %v3877_v42 = vsub.f32 %v6783_v30, %v3849_v38  ;;  %v3878_v52 = vsub.f32 %v6780_v26, %v3853_v39 }
 0xe57   : > { %v3882_v9 = vadd.f32 1e-05, %v3832_v3  ;;  %v3879_v31 = vsub.f32 %v6786_v32, %v3857_v40  ;;  %v3880_v53 = vsub.f32 %v6789_v28, %v3861_v43  ;;  %v3881_v12 = vsub.f32 %v6800_v33, %v3865_v44 }
 0xe59   : > { %5527 = vrsqrt.f32 %v3882_v9 }
 0xe63   : > { %v5528_v11 = vpop.eup %5527 }
 0xe64   : > { %v3888_v54 = vrot.slane %v5528_v11, %v6572_v62  ;;  %v3892_v18 = vrot.slane %v5528_v11, %v6575_v63  ;;  %v3896_v48 = vrot.slane %v5528_v11, %v6578_v0  ;;  %v3900_v51 = vrot.slane %v5528_v11, %v6581_v1 }
 0xe65   : > { %v3904_v21 = vrot.slane %v5528_v11, %v6584_v2  ;;  %v3908_v30 = vrot.slane %v5528_v11, %v6587_v4  ;;  %v3912_v26 = vrot.slane %v5528_v11, %v6590_v5  ;;  %v3916_v32 = vrot.slane %v5528_v11, %v6593_v7 }
 0xe66   : > { %v3925_v55 = vmul.f32 %v3888_v54, %v3874_v15  ;;  %v3926_v28 = vmul.f32 %v3892_v18, %v3875_v41  ;;  %v3927_v56 = vmul.f32 %v3896_v48, %v3876_v8  ;;  %v3928_v33 = vmul.f32 %v3900_v51, %v3877_v42 }
 0xe67   : > { %v3929_v57 = vmul.f32 %v3904_v21, %v3878_v52  ;;  %v3930_v58 = vmul.f32 %v3908_v30, %v3879_v31  ;;  %v3931_v3 = vmul.f32 %v3912_v26, %v3880_v53  ;;  %v3932_v59 = vmul.f32 %v3916_v32, %v3881_v12  ;;  %v5051_v53 = vld [vmem:[%s7237_s24] ss:$0 sm:$0xff]  ;;  %s5739_s24 = sshll.u32 %s5853_s16, 4  ;;  %s5740_s24 = int_to_ptr.vmem [resolvable:$false] %s5739_s24 }
 0xe68   : > { %v3997_v61 = vmul.f32 %v3963_v20, %v3925_v55  ;;  %v3998_v9 = vmul.f32 %v3977_v24, %v3926_v28  ;;  %v3999_v10 = vmul.f32 %v3985_v6, %v3927_v56  ;;  %v4000_v13 = vmul.f32 %v3987_v47, %v3928_v33  ;;  %v4225_v47 = vld [vmem:[%s7235_s5 + $0x38] sm:$0xff]  ;;  %s5741_s30 = scalar_lea.vmem %s5740_s24, 256  ;;  %p5742_p1 = scmp.lt.s32.totalorder %s7045_s21, %s5740_s24 }
 0xe69   : > { %v4001_v19 = vmul.f32 %v3970_v60, %v3929_v57  ;;  %v4002_v17 = vmul.f32 %v3984_v23, %v3930_v58  ;;  %v4003_v34 = vmul.f32 %v3986_v46, %v3931_v3  ;;  %v4004_v37 = vmul.f32 %v3988_v45, %v3932_v59  ;;  %v4224_v46 = vld [vmem:[%s7235_s5 + $0x30] sm:$0xff]  ;;  %p5743_p11 = scmp.lt.s32.totalorder %s5741_s30, %s5735_s4 }
 0xe6a   : > { %v4069_v16 = vadd.f32 %v4035_v29, %v3997_v61  ;;  %v4070_v38 = vadd.f32 %v4049_v35, %v3998_v9  ;;  %v4071_v39 = vadd.f32 %v4057_v49, %v3999_v10  ;;  %v4072_v40 = vadd.f32 %v4059_v27, %v4000_v13  ;;  %v5049_v49 = vld [vmem:[%s7236_s12] ss:$0 sm:$0xff]  ;;  %s7043_s12 = scalar_lea.hbm %s7238_s27, %s5058_s9 }
 0xe6b   : > { %v4073_v43 = vadd.f32 %v4042_v22, %v4001_v19  ;;  %v4074_v44 = vadd.f32 %v4056_v36, %v4002_v17  ;;  %v4075_v15 = vadd.f32 %v4058_v50, %v4003_v34  ;;  %v4076_v41 = vadd.f32 %v4060_v14, %v4004_v37  ;;  %p5744_p2 = por %p5743_p11, %p5742_p1 }
 0xe6c   : > { %v4096_v8 = vcombine.low %v4069_v16, %v4070_v38  ;;  %v4097_v42 = vcombine.low %v4071_v39, %v4072_v40  ;;  %v5351_v45 = vpack.c.bf16 %v4225_v47, %v4224_v46 }
 0xe6d   : > { %v4098_v11 = vcombine.low %v4073_v43, %v4074_v44  ;;  %v4099_v52 = vcombine.low %v4075_v15, %v4076_v41  ;;  %p5745_p4 = pnand %p5744_p2, %p5738_p13 }
 0xe6e   : > { %v4106_v20 = vrot.slane %v4096_v8, %v6342_v25  ;;  %v4113_v24 = vrot.slane %v4097_v42, %v6342_v25  ;;  %5352 = vmatpush3.bf16.msra.mxu1 %v5351_v45 }
 0xe6f   : > { %v4120_v60 = vrot.slane %v4098_v11, %v6342_v25  ;;  %v4127_v23 = vrot.slane %v4099_v52, %v6342_v25 }
 0xe70   : > { %v4128_v29 = vcombine.low %v4106_v20, %v4113_v24 }
 0xe71   : > { %v4129_v35 = vcombine.low %v4120_v60, %v4127_v23 }
 0xe72   : > { %v4136_v6 = vrot.slane %v4128_v29, %v6342_v25 }
 0xe73   : > { %v4143_v22 = vrot.slane %v4129_v35, %v6342_v25 }
 0xe75   : > { %v4144_v36 = vcombine.low %v4136_v6, %v4143_v22 }
 0xe77   : > { %5296 = vmatmul.mubr.msk.f32.vlgmr.msra.gmra.mrb[24].mxu0 %vm912_vm1, %v4144_v36 }
 0xf4a   : > { %v4213_v50 = vpop.f32.mrb[24].mxu0 }
 0xf4b   : > { %v4214_v27 = vadd.f32 %v5049_v49, %v4213_v50  ;;  %v5297_v14 = vpop.f32.mrb[25].mxu0 }
 0xf4d   : > { %v4217_v31 = vmax.f32 %v4214_v27, 0.0 }
 0xf4f   : > { %5315 = vmatmul.mubr.msk.f32.vlgmr.msra.gmra.mrb[28].mxu1 %vm2521_vm3, %v4217_v31 }
0x1022   : > { %v4302_v12 = vpop.f32.mrb[28].mxu1 }
0x1023   : > { %v4303_v54 = vadd.f32 %v5051_v53, %v4302_v12  ;;  %v5316_v18 = vpop.f32.mrb[29].mxu1 }
0x1025   : > { %v4307_v48 = vcombine.high %v4303_v54, %v4303_v54  ;;  %v4314_v51 = vrot.slane %v4303_v54, %v6342_v25 }
0x1027   : > { %v4321_v21 = vrot.slane %v4307_v48, %v6342_v25  ;;  %v4322_v30 = vcombine.high %v4314_v51, %v4314_v51  ;;  %v4330_v26 = vrot.slane %v4314_v51, %v6342_v25 }
0x1029   : > { %v4323_v32 = vcombine.high %v4321_v21, %v4321_v21  ;;  %v4337_v55 = vrot.slane %v4321_v21, %v6342_v25  ;;  %v4344_v28 = vrot.slane %v4322_v30, %v6342_v25  ;;  %v4352_v56 = vcombine.high %v4330_v26, %v4330_v26  ;;  %v5054_v30 = vld [vmem:[%s7223_s17 + $0x2] ss:$0 sm:$0xff] }
0x102a   : > { %v6933_v33 = vadd.f32 %v4330_v26, %v4069_v16  ;;  %v5056_v26 = vld [vmem:[%s7225_s29 + $0x2] ss:$0 sm:$0xff] }
0x102b   : > { %v4351_v57 = vrot.slane %v4323_v32, %v6342_v25  ;;  %v4353_v58 = vcombine.high %v4337_v55, %v4337_v55  ;;  %v4354_v3 = vcombine.high %v4344_v28, %v4344_v28  ;;  %v6936_v59 = vadd.f32 %v4344_v28, %v4070_v38 }
0x102c   : > { %v6938_v61 = vadd.f32 %v4352_v56, %v4071_v39  ;;  %v6940_v9 = vadd.f32 %v4337_v55, %v4073_v43  ;;  %v4434_v34 = vmul.f32 %v6933_v33, %v6933_v33  ;;  %v4613_v28 = vcombine.high %v5054_v30, %v5054_v30 }
0x102d   : > { %v4355_v10 = vcombine.high %v4351_v57, %v4351_v57  ;;  %v6942_v13 = vadd.f32 %v4354_v3, %v4072_v40  ;;  %v6944_v19 = vadd.f32 %v4351_v57, %v4074_v44  ;;  %v6946_v17 = vadd.f32 %v4353_v58, %v4075_v15 }
0x102e   : > { %v4380_v37 = vcombine.low %v6933_v33, %v6936_v59  ;;  %v4435_v16 = vmul.f32 %v6936_v59, %v6936_v59  ;;  %v4436_v38 = vmul.f32 %v6938_v61, %v6938_v61  ;;  %v4438_v8 = vmul.f32 %v6940_v9, %v6940_v9 }
0x102f   : > { %v6956_v39 = vadd.f32 %v4355_v10, %v4076_v41  ;;  %v4381_v40 = vcombine.low %v6938_v61, %v6942_v13  ;;  %v4382_v43 = vcombine.low %v6940_v9, %v6944_v19  ;;  %v4437_v44 = vmul.f32 %v6942_v13, %v6942_v13 }
0x1030   : > { %v4390_v15 = vrot.slane %v4380_v37, %v6342_v25  ;;  %v4439_v42 = vmul.f32 %v6944_v19, %v6944_v19  ;;  %v4450_v11 = vcombine.low %v4434_v34, %v4435_v16  ;;  %v4440_v20 = vmul.f32 %v6946_v17, %v6946_v17 }
0x1031   : > { %v4383_v41 = vcombine.low %v6946_v17, %v6956_v39  ;;  %v4397_v52 = vrot.slane %v4381_v40, %v6342_v25  ;;  %v4441_v24 = vmul.f32 %v6956_v39, %v6956_v39  ;;  %v4451_v60 = vcombine.low %v4436_v38, %v4437_v44 }
0x1032   : > { %v4452_v23 = vcombine.low %v4438_v8, %v4439_v42  ;;  %v4404_v29 = vrot.slane %v4382_v43, %v6342_v25  ;;  %v4460_v36 = vrot.slane %v4450_v11, %v6342_v25  ;;  %v4685_v56 = vcombine.high %v5056_v26, %v5056_v26 }
0x1033   : > { %v4411_v35 = vrot.slane %v4383_v41, %v6342_v25  ;;  %v4412_v6 = vcombine.low %v4390_v15, %v4397_v52  ;;  %v4453_v22 = vcombine.low %v4440_v20, %v4441_v24  ;;  %v4467_v46 = vrot.slane %v4451_v60, %v6342_v25 }
0x1034   : > { %v4474_v45 = vrot.slane %v4452_v23, %v6342_v25  ;;  %v4620_v3 = vrot.slane %v5054_v30, %v6342_v25  ;;  %v4627_v10 = vrot.slane %v4613_v28, %v6342_v25  ;;  %v4692_v37 = vrot.slane %v5056_v26, %v6342_v25 }
0x1035   : > { %v4413_v47 = vcombine.low %v4404_v29, %v4411_v35  ;;  %v4481_v49 = vrot.slane %v4453_v22, %v6342_v25  ;;  %v4482_v50 = vcombine.low %v4460_v36, %v4467_v46  ;;  %v4420_v27 = vrot.slane %v4412_v6, %v6342_v25 }
0x1036   : > { %v4699_v16 = vrot.slane %v4685_v56, %v6342_v25  ;;  %v4628_v40 = vcombine.high %v4620_v3, %v4620_v3  ;;  %v4629_v43 = vcombine.high %v4627_v10, %v4627_v10  ;;  %v4636_v44 = vrot.slane %v4620_v3, %v6342_v25 }
0x1037   : > { %v4427_v14 = vrot.slane %v4413_v47, %v6342_v25  ;;  %v4483_v31 = vcombine.low %v4474_v45, %v4481_v49  ;;  %v4490_v12 = vrot.slane %v4482_v50, %v6342_v25  ;;  %v4700_v15 = vcombine.high %v4692_v37, %v4692_v37 }
0x1038   : > { %v4701_v8 = vcombine.high %v4699_v16, %v4699_v16  ;;  %v4643_v42 = vrot.slane %v4627_v10, %v6342_v25  ;;  %v4650_v11 = vrot.slane %v4628_v40, %v6342_v25  ;;  %v4657_v41 = vrot.slane %v4629_v43, %v6342_v25 }
0x1039   : > { %v4428_v53 = vcombine.low %v4420_v27, %v4427_v14  ;;  %v4497_v54 = vrot.slane %v4483_v31, %v6342_v25  ;;  %v4708_v52 = vrot.slane %v4692_v37, %v6342_v25  ;;  %v4658_v20 = vcombine.high %v4636_v44, %v4636_v44 }
0x103a   : > { %v7004_v24 = vrot.slane %v4699_v16, %v6342_v25  ;;  %v4722_v60 = vrot.slane %v4700_v15, %v6342_v25  ;;  %v7008_v23 = vrot.slane %v4701_v8, %v6342_v25  ;;  %v4659_v49 = vcombine.high %v4643_v42, %v4643_v42 }
0x103b   : > { %v4430_v18 = vsel %vm912_vm1, %v4428_v53, 0.0  ;;  %v4498_v48 = vcombine.low %v4490_v12, %v4497_v54  ;;  %v4660_v50 = vcombine.high %v4650_v11, %v4650_v11  ;;  %v4661_v25 = vcombine.high %v4657_v41, %v4657_v41 }
0x103c   : > { %4431 = vadd.xlane.f32.xlu0 %v4430_v18  ;;  %v4730_v27 = vcombine.high %v4708_v52, %v4708_v52  ;;  %v4731_v14 = vcombine.high %v7004_v24, %v7004_v24  ;;  %v4732_v31 = vcombine.high %v4722_v60, %v4722_v60  ;;  %v4733_v53 = vcombine.high %v7008_v23, %v7008_v23 }
0x103d   : > { %v4500_v51 = vsel %vm912_vm1, %v4498_v48, 0.0 }
0x1040   : > { %4501 = vadd.xlane.f32.xlu0 %v4500_v51 }
0x10c9   : > { %v4432_v21 = vpop.xlane.xlu0 %4431 }
0x10ca   : > { %v4433_v32 = vmul.f32 0.03125, %v4432_v21 }
0x10cc   : > { %v4504_v57 = vmul.f32 %v4433_v32, %v4433_v32  ;;  %v4510_v29 = vrot.slane %v4433_v32, %v6572_v62  ;;  %v4514_v35 = vrot.slane %v4433_v32, %v6575_v63  ;;  %v4518_v6 = vrot.slane %v4433_v32, %v6578_v0 }
0x10cd   : > { %v4502_v55 = vpop.xlane.xlu0 %4501  ;;  %v4522_v22 = vrot.slane %v4433_v32, %v6581_v1  ;;  %v4526_v36 = vrot.slane %v4433_v32, %v6584_v2  ;;  %v4530_v46 = vrot.slane %v4433_v32, %v6587_v4  ;;  %v4534_v47 = vrot.slane %v4433_v32, %v6590_v5 }
0x10ce   : > { %v4503_v58 = vmul.f32 0.03125, %v4502_v55  ;;  %v4538_v45 = vrot.slane %v4433_v32, %v6593_v7  ;;  %v4547_v12 = vsub.f32 %v6933_v33, %v4510_v29  ;;  %v4548_v54 = vsub.f32 %v6936_v59, %v4514_v35 }
0x10cf   : > { %v4549_v18 = vsub.f32 %v6938_v61, %v4518_v6  ;;  %v4550_v48 = vsub.f32 %v6942_v13, %v4522_v22  ;;  %v4551_v21 = vsub.f32 %v6940_v9, %v4526_v36  ;;  %v4552_v30 = vsub.f32 %v6944_v19, %v4530_v46 }
0x10d0   : > { %v4505_v34 = vsub.f32 %v4503_v58, %v4504_v57  ;;  %v4553_v26 = vsub.f32 %v6946_v17, %v4534_v47  ;;  %v4554_v32 = vsub.f32 %v6956_v39, %v4538_v45 }
0x10d2   : > { %v4555_v38 = vadd.f32 1e-05, %v4505_v34 }
0x10d4   : > { %5529 = vrsqrt.f32 %v4555_v38 }
0x10de   : > { %v5530_v51 = vpop.eup %5529 }
0x10df   : > { %v4561_v55 = vrot.slane %v5530_v51, %v6572_v62  ;;  %v4565_v33 = vrot.slane %v5530_v51, %v6575_v63  ;;  %v4569_v59 = vrot.slane %v5530_v51, %v6578_v0  ;;  %v4573_v61 = vrot.slane %v5530_v51, %v6581_v1 }
0x10e0   : > { %v4577_v13 = vrot.slane %v5530_v51, %v6584_v2  ;;  %v4581_v9 = vrot.slane %v5530_v51, %v6587_v4  ;;  %v4585_v19 = vrot.slane %v5530_v51, %v6590_v5  ;;  %v4589_v17 = vrot.slane %v5530_v51, %v6593_v7 }
0x10e1   : > { %v4598_v28 = vmul.f32 %v4561_v55, %v4547_v12  ;;  %v4599_v39 = vmul.f32 %v4565_v33, %v4548_v54  ;;  %v4600_v56 = vmul.f32 %v4569_v59, %v4549_v18  ;;  %v4601_v62 = vmul.f32 %v4573_v61, %v4550_v48 }
0x10e2   : > { %v4602_v57 = vmul.f32 %v4577_v13, %v4551_v21  ;;  %v4603_v58 = vmul.f32 %v4581_v9, %v4552_v30  ;;  %v4604_v63 = vmul.f32 %v4585_v19, %v4553_v26  ;;  %v4605_v3 = vmul.f32 %v4589_v17, %v4554_v32 }
0x10e3   : > { %v4670_v0 = vmul.f32 %v4636_v44, %v4598_v28  ;;  %v4671_v1 = vmul.f32 %v4650_v11, %v4599_v39  ;;  %v4672_v2 = vmul.f32 %v4658_v20, %v4600_v56  ;;  %v4673_v10 = vmul.f32 %v4660_v50, %v4601_v62 }
0x10e4   : > { %v4674_v4 = vmul.f32 %v4643_v42, %v4602_v57  ;;  %v4675_v34 = vmul.f32 %v4657_v41, %v4603_v58  ;;  %v4676_v5 = vmul.f32 %v4659_v49, %v4604_v63  ;;  %v4677_v37 = vmul.f32 %v4661_v25, %v4605_v3 }
0x10e5   : > { %v4742_v7 = vadd.f32 %v4708_v52, %v4670_v0  ;;  %v4743_v16 = vadd.f32 %v4722_v60, %v4671_v1  ;;  %v4744_v38 = vadd.f32 %v4730_v27, %v4672_v2  ;;  %v4745_v40 = vadd.f32 %v4732_v31, %v4673_v10 }
0x10e6   : > { %v4746_v43 = vadd.f32 %v7004_v24, %v4674_v4  ;;  %v4747_v44 = vadd.f32 %v7008_v23, %v4675_v34  ;;  %v4748_v15 = vadd.f32 %v4731_v14, %v4676_v5  ;;  %v4749_v8 = vadd.f32 %v4733_v53, %v4677_v37 }
0x10e7   : > { %4751 = vst.msk [vmem:[%s822_s23] sm:$0x1] %vm4750_vm4, %v4742_v7  ;;  %4752 = vst.msk [vmem:[%s822_s23 + $0x1] sm:$0x1] %vm4750_vm4, %v4743_v16 }
0x10e8   : > { %4753 = vst.msk [vmem:[%s822_s23 + $0x2] sm:$0x1] %vm4750_vm4, %v4744_v38  ;;  %4754 = vst.msk [vmem:[%s822_s23 + $0x3] sm:$0x1] %vm4750_vm4, %v4745_v40 }
0x10e9   : > { %4755 = vst.msk [vmem:[%s822_s23 + $0x4] sm:$0x1] %vm4750_vm4, %v4746_v43  ;;  %4756 = vst.msk [vmem:[%s822_s23 + $0x5] sm:$0x1] %vm4750_vm4, %v4747_v44 }
0x10ea   : > { %4757 = vst.msk [vmem:[%s822_s23 + $0x6] sm:$0x1] %vm4750_vm4, %v4748_v15  ;;  %4758 = vst.msk [vmem:[%s822_s23 + $0x7] sm:$0x1] %vm4750_vm4, %v4749_v8 }
0x10eb   : > { %5748 = shalt.err (!%p5745_p4)
}
0x10ec   : > { %s5749_s0 = scalar_lea.hbm %s7043_s12, 128  ;;  %s5753_s9 = scalar_lea.hbm %s7238_s27, 256 }
0x10ed   : > { %p5750_p0 = scmp.ne.s32.totalorder %s7043_s12, %s5749_s0  ;;  %p5754_p7 = scmp.lt.u32.totalorder %s7043_s12, %s7238_s27 }
0x10ee   : > { %p5755_p6 = scmp.lt.u32.totalorder %s5753_s9, %s5749_s0  ;;  %p5757_p12 = scmp.lt.u32.totalorder %s5749_s0, %s7043_s12 }
0x10ef   : > { %p5751_p8 = pnand %p5750_p0, %p7240_p5 }
0x10f0   : > { %p5756_p9 = por %p5755_p6, %p5754_p7 }
0x10f1   : > { %p5752_p3 = pneg %p5751_p8 }
0x10f2   : > { %p5758_p10 = por %p5757_p12, %p5756_p9 }
0x10f4   : > { %p5759_p13 = pnand %p5758_p10, %p5752_p3 }
0x10f6   : > { %5762 = shalt.err (!%p5759_p13)
}
0x10f7   : > { %s5854_s1 = smov 16   ;;  %s5855_s4 = smov 1  }
0x10f8   : > { %s7241_s16 = smov 32  }
0x10f9   : > { %5379 = dma.vmem_to_hbm [thread:$0]  (%p7240_p5), %s7045_s21, 128, %s7043_s12, %s4760_s13, %s5854_s1, %s7241_s16, %s5855_s4  }
0x10fa PF: > { %s7242_s24 = sld [smem:[#allocation25_spill]]  ;;  %s7243_s30 = sld [smem:[#allocation28_spill]] }
0x10fb   : > { %s7244_s3 = sld [smem:[#allocation27_spill]] }
0x1100   : > { %s4787_s15 = sand.u32 1, %s7242_s24   ;;  %p7245_p1 = scmp.ne.s32.totalorder %s7243_s30, 0 }
0x1101   : > { %p7246_p11 = scmp.ge.s32.totalorder %s7244_s3, 2  ;;  %s4788_s0 = scalar_lea.sflag [#allocation4], %s4787_s15 }
0x1103   : > { %p5408_p2 = pnand %p7246_p11, %p7245_p1 }
0x1105   : > { %5804 = dma.done.wait (!%p5408_p2), %s4788_s0, 128  }
0x1106   : > { %5806 = vsyncadd (!%p5408_p2), %s4788_s0, 4294967168  ;;  %s7247_s24 = sld [smem:[#allocation29_spill]]  ;;  %s7248_s9 = sld [smem:[#allocation26_spill]] }
0x1107   : > { %s7249_s23 = sld [smem:[#allocation30_spill]]  ;;  %s7250_s1 = smov %s5813_s22 }
0x110c   : > { %p40_p4 = scmp.ge.s32.totalorder %s7247_s24, 4   ;;  %s7251_s22 = smov %s7248_s9 }
0x110e   :  { %42 = sbr.rel (!%p40_p4) target bundleno = 28 (0x1c), region = 203 }
0x1115   :  { %4793 = vsyncpa [#allocation3], 1 }
0x1116   :  { %4795 = vsyncpa [#allocation3 + $0x1], 1 }
0x1117   :  { %4796 = vsyncpa [#allocation7], 1 }
0x1118   :  { %4798 = vsyncpa [#allocation7 + $0x1], 1 }
0x1119   :  { %4799 = vsyncpa [#allocation10], 1 }
0x111a   :  { %4800 = vsyncpa [#allocation13], 1 }
0x111b   :  { %4801 = vsyncpa [#allocation4], 1 }
0x111c   :  { %4803 = vsyncpa [#allocation4 + $0x1], 1 }
0x111d   :  { %4804 = vsyncpa [#allocation5], 1 }
0x111e   :  { %4806 = vsyncpa [#allocation5 + $0x1], 1 }
0x111f   :  { %4807 = vsyncpa [#allocation16], 1 }

</bundles_post_ra>
